<compile_context>
chip_gen: v6e
topology: v6e:2x2x1
jax: 0.10.0
libtpu: 0.0.40
codegen_flags: <defaults>
</compile_context>

<pallas_src>
import functools

import jax
import jax.numpy as jnp
import numpy as np
from jax.experimental import pallas as pl
from jax.experimental.pallas import tpu as pltpu


def get_relative_position_bias_index(window_size):
    """Standard Swin relative-position index, computed with numpy (host-side glue)."""
    Wh, Ww = window_size
    coords_h = np.arange(Wh)
    coords_w = np.arange(Ww)
    coords = np.stack(np.meshgrid(coords_h, coords_w, indexing="ij"))         # (2, Wh, Ww)
    coords_flatten = coords.reshape(2, -1)                                     # (2, N)
    relative_coords = coords_flatten[:, :, None] - coords_flatten[:, None, :]  # (2, N, N)
    relative_coords = relative_coords.transpose(1, 2, 0).copy()                # (N, N, 2)
    relative_coords[:, :, 0] += Wh - 1
    relative_coords[:, :, 1] += Ww - 1
    relative_coords[:, :, 0] *= 2 * Ww - 1
    return relative_coords.sum(-1)                                             # (N, N) int


def window_attention_kernel(x_ref, wqkv_ref, bqkv_ref, bias_ref, wout_ref, bout_ref,
                            o_ref, *, num_heads, compute_dtype):
    """One grid step = B_BLK windows. Fused qkv proj -> attention -> out proj."""
    Bb, N, C = x_ref.shape
    H = num_heads
    hd = C // H

    # ---- QKV projection on the flattened slab: (Bb*N, C) @ (C, 3C) + (3C,) ----
    x2d = x_ref[...].reshape(Bb * N, C)
    qkv = jnp.dot(x2d, wqkv_ref[...], preferred_element_type=jnp.float32) + bqkv_ref[0]
    qkv = qkv.reshape(Bb, N, 3 * C)                                            # (Bb, N, 3C)

    # ---- Per-head attention, batched over the Bb windows in this block ----
    head_outs = []
    for h in range(H):                                                         # static unroll; H small
        q_h = qkv[:, :, 0 * C + h * hd:0 * C + (h + 1) * hd].astype(compute_dtype)  # (Bb, N, hd)
        k_h = qkv[:, :, 1 * C + h * hd:1 * C + (h + 1) * hd].astype(compute_dtype)
        v_h = qkv[:, :, 2 * C + h * hd:2 * C + (h + 1) * hd].astype(compute_dtype)

        # scale is pre-folded into wqkv / bqkv host-side
        s = jnp.einsum('bqd,bkd->bqk', q_h, k_h,
                       preferred_element_type=jnp.float32)                     # (Bb, N, N)
        s = s + bias_ref[h][None, :, :]                                        # + rel pos bias

        s = s - jnp.max(s, axis=-1, keepdims=True)
        p = jnp.exp(s)
        p = p * pl.reciprocal(jnp.sum(p, axis=-1, keepdims=True), approx=False)  # softmax(-1)

        head_outs.append(
            jnp.einsum('bqk,bkd->bqd', p.astype(compute_dtype), v_h,
                       preferred_element_type=jnp.float32))                    # (Bb, N, hd)

    ctx = jnp.concatenate(head_outs, axis=-1)                                  # (Bb, N, C) == torch transpose+reshape

    # ---- Output projection on the flattened slab: (Bb*N, C) @ (C, C) + (C,) ----
    y = jnp.dot(ctx.reshape(Bb * N, C).astype(compute_dtype), wout_ref[...],
                preferred_element_type=jnp.float32) + bout_ref[0]
    o_ref[...] = y.reshape(Bb, N, C).astype(o_ref.dtype)


def window_attention(x, params, window_size, num_heads, qk_scale=None, mask=None,
                     *, b_blk=None, compute_dtype=jnp.float32):
    if mask is not None:
        raise NotImplementedError("shifted-window mask path is not implemented")

    B_, N, C = x.shape
    head_dim = C // num_heads
    scale = qk_scale or head_dim ** (-0.5)

    # ---- choose the window-block size (sweepable; keep >=2 grid steps for v7x) ----
    if b_blk is None:
        b_blk = min(128, B_) if B_ > 1 else 1
        if B_ > 1 and pl.cdiv(B_, b_blk) < 2:
            b_blk = pl.cdiv(B_, 2)
    grid_b = pl.cdiv(B_, b_blk)
    B_pad = grid_b * b_blk

    # ---- host-side glue: relative-position bias gather -> (H, N, N) ----
    rel_idx = get_relative_position_bias_index(window_size)                    # (N, N)
    table = params["rel_bias_table"]                                           # ((2Wh-1)*(2Ww-1), H)
    rel_bias = table[rel_idx.reshape(-1)].reshape(N, N, num_heads)
    rel_bias = jnp.transpose(rel_bias, (2, 0, 1)).astype(jnp.float32)          # (H, N, N)

    # ---- fold the q scale into the q-columns of W_qkv / b_qkv (one-time transform) ----
    col_scale = jnp.concatenate(
        [jnp.full((C,), scale, jnp.float32), jnp.ones((2 * C,), jnp.float32)])
    wqkv = (params["wqkv"].astype(jnp.float32) * col_scale[None, :]).astype(compute_dtype)
    bqkv = (params["bqkv"].astype(jnp.float32) * col_scale).reshape(1, 3 * C)  # biases stay f32
    wout = params["wout"].astype(compute_dtype)                                # (C, C)
    bout = params["bout"].astype(jnp.float32).reshape(1, C)                    # (1, C)

    # ---- pad the window axis up to a multiple of the block size ----
    x_in = x.astype(compute_dtype)
    if B_pad != B_:
        x_in = jnp.concatenate(
            [x_in, jnp.zeros((B_pad - B_, N, C), compute_dtype)], axis=0)

    kernel = functools.partial(window_attention_kernel,
                               num_heads=num_heads, compute_dtype=compute_dtype)

    out = pl.pallas_call(
        kernel,
        out_shape=jax.ShapeDtypeStruct((B_pad, N, C), x.dtype),
        grid_spec=pltpu.PrefetchScalarGridSpec(
            num_scalar_prefetch=0,
            grid=(grid_b,),
            in_specs=[
                pl.BlockSpec((b_blk, N, C), lambda b: (b, 0, 0)),              # x block
                # constant-index inputs: Pallas keeps them resident across grid steps
                pl.BlockSpec((C, 3 * C), lambda b: (0, 0)),                    # W_qkv (scale folded)
                pl.BlockSpec((1, 3 * C), lambda b: (0, 0)),                    # b_qkv
                pl.BlockSpec((num_heads, N, N), lambda b: (0, 0, 0)),          # relative position bias
                pl.BlockSpec((C, C), lambda b: (0, 0)),                        # W_out
                pl.BlockSpec((1, C), lambda b: (0, 0)),                        # b_out
            ],
            out_specs=pl.BlockSpec((b_blk, N, C), lambda b: (b, 0, 0)),
        ),
        compiler_params=pltpu.CompilerParams(dimension_semantics=("parallel",)),
    )(x_in, wqkv, bqkv, rel_bias, wout, bout)

    return out[:B_] if B_pad != B_ else out


def window_attention_reference(x, params, window_size, num_heads, qk_scale=None):
    """Pure-JAX reference mirroring the PyTorch forward (mask=None, eval mode)."""
    B_, N, C = x.shape
    hd = C // num_heads
    scale = qk_scale or hd ** (-0.5)

    rel_idx = get_relative_position_bias_index(window_size)
    table = params["rel_bias_table"]
    rel_bias = table[rel_idx.reshape(-1)].reshape(N, N, num_heads)
    rel_bias = jnp.transpose(rel_bias, (2, 0, 1))                              # (H, N, N)

    qkv = x @ params["wqkv"] + params["bqkv"]                                  # (B_, N, 3C)
    qkv = qkv.reshape(B_, N, 3, num_heads, hd).transpose(2, 0, 3, 1, 4)        # (3, B_, H, N, hd)
    q, k, v = qkv[0], qkv[1], qkv[2]
    q = q * scale
    attn = q @ jnp.swapaxes(k, -2, -1)                                         # (B_, H, N, N)
    attn = attn + rel_bias[None]
    attn = jax.nn.softmax(attn, axis=-1)
    out = (attn @ v).transpose(0, 2, 1, 3).reshape(B_, N, C)
    return out @ params["wout"] + params["bout"]


def init_params(key, dim, window_size, num_heads):
    Wh, Ww = window_size
    k1, k2, k3, k4, k5, _ = jax.random.split(key, 6)
    bound = 1.0 / np.sqrt(dim)
    return {
        # trunc_normal_(std=0.2)
        "rel_bias_table": 0.2 * jax.random.truncated_normal(
            k1, -2.0, 2.0, ((2 * Wh - 1) * (2 * Ww - 1), num_heads), jnp.float32),
        "wqkv": jax.random.uniform(k2, (dim, 3 * dim), jnp.float32, -bound, bound),
        "bqkv": jax.random.uniform(k3, (3 * dim,), jnp.float32, -bound, bound),
        "wout": jax.random.uniform(k4, (dim, dim), jnp.float32, -bound, bound),
        "bout": jax.random.uniform(k5, (dim,), jnp.float32, -bound, bound),
    }


if __name__ == "__main__":
    dim = 32
    num_heads = 4
    window_size = (4, 4)
    N = window_size[0] * window_size[1]   # 16 tokens per window
    B_ = 8                                # num_windows * batch

    key = jax.random.PRNGKey(0)
    kx, kp = jax.random.split(key)
    x = jax.random.normal(kx, (B_, N, dim), jnp.float32)
    params = init_params(kp, dim, window_size, num_heads)

    # default block size heuristic (grid has >=2 steps)
    out = jax.block_until_ready(window_attention(x, params, window_size, num_heads))
    ref = jax.block_until_ready(window_attention_reference(x, params, window_size, num_heads))
    np.testing.assert_allclose(np.asarray(out), np.asarray(ref), rtol=1e-4, atol=1e-4)

    # non-divisible B_ exercises the padding path (B_=6 padded to 8 with b_blk=4)
    x2 = x[:6]
    out2 = jax.block_until_ready(
        window_attention(x2, params, window_size, num_heads, b_blk=4))
    ref2 = jax.block_until_ready(
        window_attention_reference(x2, params, window_size, num_heads))
    np.testing.assert_allclose(np.asarray(out2), np.asarray(ref2), rtol=1e-4, atol=1e-4)

    print("KERNEL_OK")
</pallas_src>

<mosaic_0001>
module attributes {stable_mosaic.version = 11 : i64} {
  func.func @window_attention_kernel(%arg0: i32, %arg1: memref<4x16x32xf32, #tpu.memory_space<vmem>>, %arg2: memref<32x96xf32, #tpu.memory_space<vmem>>, %arg3: memref<1x96xf32, #tpu.memory_space<vmem>>, %arg4: memref<4x16x16xf32, #tpu.memory_space<vmem>>, %arg5: memref<32x32xf32, #tpu.memory_space<vmem>>, %arg6: memref<1x32xf32, #tpu.memory_space<vmem>>, %arg7: memref<4x16x32xf32, #tpu.memory_space<vmem>>) attributes {dimension_semantics = [#tpu.dimension_semantics<parallel>], iteration_bounds = array<i64: 2>, scalar_prefetch = 0 : i64, scratch_operands = 0 : i64, tpu.core_type = #tpu.core_type<tc>, window_params = [{transform_indices = @transform_0, window_bounds = array<i64: 4, 16, 32>}, {pipeline_mode = #tpu.pipeline_mode<synchronous>, transform_indices = @transform_1, window_bounds = array<i64: 32, 96>}, {pipeline_mode = #tpu.pipeline_mode<synchronous>, transform_indices = @transform_2, window_bounds = array<i64: 1, 96>}, {pipeline_mode = #tpu.pipeline_mode<synchronous>, transform_indices = @transform_3, window_bounds = array<i64: 4, 16, 16>}, {pipeline_mode = #tpu.pipeline_mode<synchronous>, transform_indices = @transform_4, window_bounds = array<i64: 32, 32>}, {pipeline_mode = #tpu.pipeline_mode<synchronous>, transform_indices = @transform_5, window_bounds = array<i64: 1, 32>}, {transform_indices = @transform_6, window_bounds = array<i64: 4, 16, 32>}]} {
    %c0 = arith.constant 0 : index
    %c0_0 = arith.constant 0 : index
    %c0_1 = arith.constant 0 : index
    %0 = vector.load %arg1[%c0, %c0_0, %c0_1] : memref<4x16x32xf32, #tpu.memory_space<vmem>>, vector<4x16x32xf32>
    %1 = vector.shape_cast %0 : vector<4x16x32xf32> to vector<64x32xf32>
    %c0_2 = arith.constant 0 : index
    %c0_3 = arith.constant 0 : index
    %2 = vector.load %arg2[%c0_2, %c0_3] : memref<32x96xf32, #tpu.memory_space<vmem>>, vector<32x96xf32>
    %cst = arith.constant dense<0.000000e+00> : vector<64x96xf32>
    %3 = tpu.matmul %1, %2, %cst {dimension_numbers = #tpu.dot_dimension_numbers<[1], [0], [0], [1], [0, 0, 1, 1], [], []>} : vector<64x32xf32>, vector<32x96xf32>, vector<64x96xf32> -> vector<64x96xf32>
    %c0_4 = arith.constant 0 : index
    %c0_5 = arith.constant 0 : index
    %4 = vector.load %arg3[%c0_4, %c0_5] : memref<1x96xf32, #tpu.memory_space<vmem>>, vector<1x96xf32>
    %5 = vector.shape_cast %4 : vector<1x96xf32> to vector<96xf32>
    %6 = vector.shape_cast %5 : vector<96xf32> to vector<1x96xf32>
    %7 = vector.broadcast %6 : vector<1x96xf32> to vector<64x96xf32>
    %8 = arith.addf %3, %7 : vector<64x96xf32>
    %9 = vector.shape_cast %8 : vector<64x96xf32> to vector<4x16x96xf32>
    %10 = vector.extract_strided_slice %9 {offsets = [0, 0, 0], sizes = [4, 16, 8], strides = [1, 1, 1]} : vector<4x16x96xf32> to vector<4x16x8xf32>
    %11 = vector.extract_strided_slice %9 {offsets = [0, 0, 32], sizes = [4, 16, 8], strides = [1, 1, 1]} : vector<4x16x96xf32> to vector<4x16x8xf32>
    %12 = vector.extract_strided_slice %9 {offsets = [0, 0, 64], sizes = [4, 16, 8], strides = [1, 1, 1]} : vector<4x16x96xf32> to vector<4x16x8xf32>
    "tpu.trace_start"() <{level = 10 : i32, message = "bqd,bkd->bqk"}> : () -> ()
    %cst_6 = arith.constant dense<0.000000e+00> : vector<4x16x16xf32>
    %13 = tpu.matmul %10, %11, %cst_6 {dimension_numbers = #tpu.dot_dimension_numbers<[2], [2], [1], [1], [0, 0, 0, 1, 1, 1], [0], [0]>} : vector<4x16x8xf32>, vector<4x16x8xf32>, vector<4x16x16xf32> -> vector<4x16x16xf32>
    "tpu.trace_stop"() : () -> ()
    %c0_7 = arith.constant 0 : index
    %c0_8 = arith.constant 0 : index
    %c0_9 = arith.constant 0 : index
    %14 = vector.load %arg4[%c0_7, %c0_8, %c0_9] : memref<4x16x16xf32, #tpu.memory_space<vmem>>, vector<1x16x16xf32>
    %15 = vector.shape_cast %14 : vector<1x16x16xf32> to vector<16x16xf32>
    %16 = vector.shape_cast %15 : vector<16x16xf32> to vector<1x16x16xf32>
    %17 = vector.broadcast %16 : vector<1x16x16xf32> to vector<4x16x16xf32>
    %18 = arith.addf %13, %17 : vector<4x16x16xf32>
    %cst_10 = arith.constant dense<0xFF800000> : vector<4x16xf32>
    %19 = vector.multi_reduction <maximumf>, %18, %cst_10 [2] : vector<4x16x16xf32> to vector<4x16xf32>
    %20 = vector.shape_cast %19 : vector<4x16xf32> to vector<4x16x1xf32>
    %21 = vector.broadcast %20 : vector<4x16x1xf32> to vector<4x16x16xf32>
    %22 = arith.subf %18, %21 : vector<4x16x16xf32>
    %23 = math.exp %22 : vector<4x16x16xf32>
    %cst_11 = arith.constant dense<0.000000e+00> : vector<4x16xf32>
    %24 = vector.multi_reduction <add>, %23, %cst_11 [2] : vector<4x16x16xf32> to vector<4x16xf32>
    %25 = vector.shape_cast %24 : vector<4x16xf32> to vector<4x16x1xf32>
    %26 = tpu.reciprocal %25 : vector<4x16x1xf32> -> vector<4x16x1xf32>
    %27 = vector.broadcast %26 : vector<4x16x1xf32> to vector<4x16x16xf32>
    %28 = arith.mulf %23, %27 : vector<4x16x16xf32>
    "tpu.trace_start"() <{level = 10 : i32, message = "bqk,bkd->bqd"}> : () -> ()
    %cst_12 = arith.constant dense<0.000000e+00> : vector<4x16x8xf32>
    %29 = tpu.matmul %28, %12, %cst_12 {dimension_numbers = #tpu.dot_dimension_numbers<[2], [1], [1], [2], [0, 0, 0, 1, 1, 2], [0], [0]>} : vector<4x16x16xf32>, vector<4x16x8xf32>, vector<4x16x8xf32> -> vector<4x16x8xf32>
    "tpu.trace_stop"() : () -> ()
    %30 = vector.extract_strided_slice %9 {offsets = [0, 0, 8], sizes = [4, 16, 8], strides = [1, 1, 1]} : vector<4x16x96xf32> to vector<4x16x8xf32>
    %31 = vector.extract_strided_slice %9 {offsets = [0, 0, 40], sizes = [4, 16, 8], strides = [1, 1, 1]} : vector<4x16x96xf32> to vector<4x16x8xf32>
    %32 = vector.extract_strided_slice %9 {offsets = [0, 0, 72], sizes = [4, 16, 8], strides = [1, 1, 1]} : vector<4x16x96xf32> to vector<4x16x8xf32>
    "tpu.trace_start"() <{level = 10 : i32, message = "bqd,bkd->bqk"}> : () -> ()
    %cst_13 = arith.constant dense<0.000000e+00> : vector<4x16x16xf32>
    %33 = tpu.matmul %30, %31, %cst_13 {dimension_numbers = #tpu.dot_dimension_numbers<[2], [2], [1], [1], [0, 0, 0, 1, 1, 1], [0], [0]>} : vector<4x16x8xf32>, vector<4x16x8xf32>, vector<4x16x16xf32> -> vector<4x16x16xf32>
    "tpu.trace_stop"() : () -> ()
    %c1 = arith.constant 1 : index
    %c0_14 = arith.constant 0 : index
    %c0_15 = arith.constant 0 : index
    %34 = vector.load %arg4[%c1, %c0_14, %c0_15] : memref<4x16x16xf32, #tpu.memory_space<vmem>>, vector<1x16x16xf32>
    %35 = vector.shape_cast %34 : vector<1x16x16xf32> to vector<16x16xf32>
    %36 = vector.shape_cast %35 : vector<16x16xf32> to vector<1x16x16xf32>
    %37 = vector.broadcast %36 : vector<1x16x16xf32> to vector<4x16x16xf32>
    %38 = arith.addf %33, %37 : vector<4x16x16xf32>
    %cst_16 = arith.constant dense<0xFF800000> : vector<4x16xf32>
    %39 = vector.multi_reduction <maximumf>, %38, %cst_16 [2] : vector<4x16x16xf32> to vector<4x16xf32>
    %40 = vector.shape_cast %39 : vector<4x16xf32> to vector<4x16x1xf32>
    %41 = vector.broadcast %40 : vector<4x16x1xf32> to vector<4x16x16xf32>
    %42 = arith.subf %38, %41 : vector<4x16x16xf32>
    %43 = math.exp %42 : vector<4x16x16xf32>
    %cst_17 = arith.constant dense<0.000000e+00> : vector<4x16xf32>
    %44 = vector.multi_reduction <add>, %43, %cst_17 [2] : vector<4x16x16xf32> to vector<4x16xf32>
    %45 = vector.shape_cast %44 : vector<4x16xf32> to vector<4x16x1xf32>
    %46 = tpu.reciprocal %45 : vector<4x16x1xf32> -> vector<4x16x1xf32>
    %47 = vector.broadcast %46 : vector<4x16x1xf32> to vector<4x16x16xf32>
    %48 = arith.mulf %43, %47 : vector<4x16x16xf32>
    "tpu.trace_start"() <{level = 10 : i32, message = "bqk,bkd->bqd"}> : () -> ()
    %cst_18 = arith.constant dense<0.000000e+00> : vector<4x16x8xf32>
    %49 = tpu.matmul %48, %32, %cst_18 {dimension_numbers = #tpu.dot_dimension_numbers<[2], [1], [1], [2], [0, 0, 0, 1, 1, 2], [0], [0]>} : vector<4x16x16xf32>, vector<4x16x8xf32>, vector<4x16x8xf32> -> vector<4x16x8xf32>
    "tpu.trace_stop"() : () -> ()
    %50 = vector.extract_strided_slice %9 {offsets = [0, 0, 16], sizes = [4, 16, 8], strides = [1, 1, 1]} : vector<4x16x96xf32> to vector<4x16x8xf32>
    %51 = vector.extract_strided_slice %9 {offsets = [0, 0, 48], sizes = [4, 16, 8], strides = [1, 1, 1]} : vector<4x16x96xf32> to vector<4x16x8xf32>
    %52 = vector.extract_strided_slice %9 {offsets = [0, 0, 80], sizes = [4, 16, 8], strides = [1, 1, 1]} : vector<4x16x96xf32> to vector<4x16x8xf32>
    "tpu.trace_start"() <{level = 10 : i32, message = "bqd,bkd->bqk"}> : () -> ()
    %cst_19 = arith.constant dense<0.000000e+00> : vector<4x16x16xf32>
    %53 = tpu.matmul %50, %51, %cst_19 {dimension_numbers = #tpu.dot_dimension_numbers<[2], [2], [1], [1], [0, 0, 0, 1, 1, 1], [0], [0]>} : vector<4x16x8xf32>, vector<4x16x8xf32>, vector<4x16x16xf32> -> vector<4x16x16xf32>
    "tpu.trace_stop"() : () -> ()
    %c2 = arith.constant 2 : index
    %c0_20 = arith.constant 0 : index
    %c0_21 = arith.constant 0 : index
    %54 = vector.load %arg4[%c2, %c0_20, %c0_21] : memref<4x16x16xf32, #tpu.memory_space<vmem>>, vector<1x16x16xf32>
    %55 = vector.shape_cast %54 : vector<1x16x16xf32> to vector<16x16xf32>
    %56 = vector.shape_cast %55 : vector<16x16xf32> to vector<1x16x16xf32>
    %57 = vector.broadcast %56 : vector<1x16x16xf32> to vector<4x16x16xf32>
    %58 = arith.addf %53, %57 : vector<4x16x16xf32>
    %cst_22 = arith.constant dense<0xFF800000> : vector<4x16xf32>
    %59 = vector.multi_reduction <maximumf>, %58, %cst_22 [2] : vector<4x16x16xf32> to vector<4x16xf32>
    %60 = vector.shape_cast %59 : vector<4x16xf32> to vector<4x16x1xf32>
    %61 = vector.broadcast %60 : vector<4x16x1xf32> to vector<4x16x16xf32>
    %62 = arith.subf %58, %61 : vector<4x16x16xf32>
    %63 = math.exp %62 : vector<4x16x16xf32>
    %cst_23 = arith.constant dense<0.000000e+00> : vector<4x16xf32>
    %64 = vector.multi_reduction <add>, %63, %cst_23 [2] : vector<4x16x16xf32> to vector<4x16xf32>
    %65 = vector.shape_cast %64 : vector<4x16xf32> to vector<4x16x1xf32>
    %66 = tpu.reciprocal %65 : vector<4x16x1xf32> -> vector<4x16x1xf32>
    %67 = vector.broadcast %66 : vector<4x16x1xf32> to vector<4x16x16xf32>
    %68 = arith.mulf %63, %67 : vector<4x16x16xf32>
    "tpu.trace_start"() <{level = 10 : i32, message = "bqk,bkd->bqd"}> : () -> ()
    %cst_24 = arith.constant dense<0.000000e+00> : vector<4x16x8xf32>
    %69 = tpu.matmul %68, %52, %cst_24 {dimension_numbers = #tpu.dot_dimension_numbers<[2], [1], [1], [2], [0, 0, 0, 1, 1, 2], [0], [0]>} : vector<4x16x16xf32>, vector<4x16x8xf32>, vector<4x16x8xf32> -> vector<4x16x8xf32>
    "tpu.trace_stop"() : () -> ()
    %70 = vector.extract_strided_slice %9 {offsets = [0, 0, 24], sizes = [4, 16, 8], strides = [1, 1, 1]} : vector<4x16x96xf32> to vector<4x16x8xf32>
    %71 = vector.extract_strided_slice %9 {offsets = [0, 0, 56], sizes = [4, 16, 8], strides = [1, 1, 1]} : vector<4x16x96xf32> to vector<4x16x8xf32>
    %72 = vector.extract_strided_slice %9 {offsets = [0, 0, 88], sizes = [4, 16, 8], strides = [1, 1, 1]} : vector<4x16x96xf32> to vector<4x16x8xf32>
    "tpu.trace_start"() <{level = 10 : i32, message = "bqd,bkd->bqk"}> : () -> ()
    %cst_25 = arith.constant dense<0.000000e+00> : vector<4x16x16xf32>
    %73 = tpu.matmul %70, %71, %cst_25 {dimension_numbers = #tpu.dot_dimension_numbers<[2], [2], [1], [1], [0, 0, 0, 1, 1, 1], [0], [0]>} : vector<4x16x8xf32>, vector<4x16x8xf32>, vector<4x16x16xf32> -> vector<4x16x16xf32>
    "tpu.trace_stop"() : () -> ()
    %c3 = arith.constant 3 : index
    %c0_26 = arith.constant 0 : index
    %c0_27 = arith.constant 0 : index
    %74 = vector.load %arg4[%c3, %c0_26, %c0_27] : memref<4x16x16xf32, #tpu.memory_space<vmem>>, vector<1x16x16xf32>
    %75 = vector.shape_cast %74 : vector<1x16x16xf32> to vector<16x16xf32>
    %76 = vector.shape_cast %75 : vector<16x16xf32> to vector<1x16x16xf32>
    %77 = vector.broadcast %76 : vector<1x16x16xf32> to vector<4x16x16xf32>
    %78 = arith.addf %73, %77 : vector<4x16x16xf32>
    %cst_28 = arith.constant dense<0xFF800000> : vector<4x16xf32>
    %79 = vector.multi_reduction <maximumf>, %78, %cst_28 [2] : vector<4x16x16xf32> to vector<4x16xf32>
    %80 = vector.shape_cast %79 : vector<4x16xf32> to vector<4x16x1xf32>
    %81 = vector.broadcast %80 : vector<4x16x1xf32> to vector<4x16x16xf32>
    %82 = arith.subf %78, %81 : vector<4x16x16xf32>
    %83 = math.exp %82 : vector<4x16x16xf32>
    %cst_29 = arith.constant dense<0.000000e+00> : vector<4x16xf32>
    %84 = vector.multi_reduction <add>, %83, %cst_29 [2] : vector<4x16x16xf32> to vector<4x16xf32>
    %85 = vector.shape_cast %84 : vector<4x16xf32> to vector<4x16x1xf32>
    %86 = tpu.reciprocal %85 : vector<4x16x1xf32> -> vector<4x16x1xf32>
    %87 = vector.broadcast %86 : vector<4x16x1xf32> to vector<4x16x16xf32>
    %88 = arith.mulf %83, %87 : vector<4x16x16xf32>
    "tpu.trace_start"() <{level = 10 : i32, message = "bqk,bkd->bqd"}> : () -> ()
    %cst_30 = arith.constant dense<0.000000e+00> : vector<4x16x8xf32>
    %89 = tpu.matmul %88, %72, %cst_30 {dimension_numbers = #tpu.dot_dimension_numbers<[2], [1], [1], [2], [0, 0, 0, 1, 1, 2], [0], [0]>} : vector<4x16x16xf32>, vector<4x16x8xf32>, vector<4x16x8xf32> -> vector<4x16x8xf32>
    "tpu.trace_stop"() : () -> ()
    %90 = tpu.concatenate %29, %49, %69, %89 in 2 : vector<4x16x8xf32>, vector<4x16x8xf32>, vector<4x16x8xf32>, vector<4x16x8xf32> -> vector<4x16x32xf32>
    %91 = vector.shape_cast %90 : vector<4x16x32xf32> to vector<64x32xf32>
    %c0_31 = arith.constant 0 : index
    %c0_32 = arith.constant 0 : index
    %92 = vector.load %arg5[%c0_31, %c0_32] : memref<32x32xf32, #tpu.memory_space<vmem>>, vector<32x32xf32>
    %cst_33 = arith.constant dense<0.000000e+00> : vector<64x32xf32>
    %93 = tpu.matmul %91, %92, %cst_33 {dimension_numbers = #tpu.dot_dimension_numbers<[1], [0], [0], [1], [0, 0, 1, 1], [], []>} : vector<64x32xf32>, vector<32x32xf32>, vector<64x32xf32> -> vector<64x32xf32>
    %c0_34 = arith.constant 0 : index
    %c0_35 = arith.constant 0 : index
    %94 = vector.load %arg6[%c0_34, %c0_35] : memref<1x32xf32, #tpu.memory_space<vmem>>, vector<1x32xf32>
    %95 = vector.shape_cast %94 : vector<1x32xf32> to vector<32xf32>
    %96 = vector.shape_cast %95 : vector<32xf32> to vector<1x32xf32>
    %97 = vector.broadcast %96 : vector<1x32xf32> to vector<64x32xf32>
    %98 = arith.addf %93, %97 : vector<64x32xf32>
    %99 = vector.shape_cast %98 : vector<64x32xf32> to vector<4x16x32xf32>
    %c0_36 = arith.constant 0 : index
    %c0_37 = arith.constant 0 : index
    %c0_38 = arith.constant 0 : index
    %100 = vector.load %arg7[%c0_36, %c0_37, %c0_38] : memref<4x16x32xf32, #tpu.memory_space<vmem>>, vector<4x16x32xf32>
    tpu.vector_store %arg7[%c0_36, %c0_37, %c0_38], %99 {strides = array<i32>} : memref<4x16x32xf32, #tpu.memory_space<vmem>>, vector<4x16x32xf32>,
    return
  }
  func.func @transform_0(%arg0: i32) -> (i32, i32, i32) {
    %c0_i32 = arith.constant 0 : i32
    %c0_i32_0 = arith.constant 0 : i32
    %c0_i32_1 = arith.constant 0 : i32
    return %arg0, %c0_i32, %c0_i32_0 : i32, i32, i32
  }
  func.func @transform_1(%arg0: i32) -> (i32, i32) {
    %c0_i32 = arith.constant 0 : i32
    %c0_i32_0 = arith.constant 0 : i32
    %c0_i32_1 = arith.constant 0 : i32
    return %c0_i32, %c0_i32_0 : i32, i32
  }
  func.func @transform_2(%arg0: i32) -> (i32, i32) {
    %c0_i32 = arith.constant 0 : i32
    %c0_i32_0 = arith.constant 0 : i32
    %c0_i32_1 = arith.constant 0 : i32
    return %c0_i32, %c0_i32_0 : i32, i32
  }
  func.func @transform_3(%arg0: i32) -> (i32, i32, i32) {
    %c0_i32 = arith.constant 0 : i32
    %c0_i32_0 = arith.constant 0 : i32
    %c0_i32_1 = arith.constant 0 : i32
    %c0_i32_2 = arith.constant 0 : i32
    return %c0_i32, %c0_i32_0, %c0_i32_1 : i32, i32, i32
  }
  func.func @transform_4(%arg0: i32) -> (i32, i32) {
    %c0_i32 = arith.constant 0 : i32
    %c0_i32_0 = arith.constant 0 : i32
    %c0_i32_1 = arith.constant 0 : i32
    return %c0_i32, %c0_i32_0 : i32, i32
  }
  func.func @transform_5(%arg0: i32) -> (i32, i32) {
    %c0_i32 = arith.constant 0 : i32
    %c0_i32_0 = arith.constant 0 : i32
    %c0_i32_1 = arith.constant 0 : i32
    return %c0_i32, %c0_i32_0 : i32, i32
  }
  func.func @transform_6(%arg0: i32) -> (i32, i32, i32) {
    %c0_i32 = arith.constant 0 : i32
    %c0_i32_0 = arith.constant 0 : i32
    %c0_i32_1 = arith.constant 0 : i32
    return %arg0, %c0_i32, %c0_i32_0 : i32, i32, i32
  }
}

</mosaic_0001>

<bundles_post_ra>
// kernel: tpu_custom_call.1
= control target key start
LH: loop header
LB: loop body
LE: loop exit
PB: predicated region body
PF: predicated region fallthrough
CT: control target
= control target key end

     0   :  { %11 = vsyncpa [#allocation3], 0  ;;  %s6057_s0 = inlined_call_operand.hbm [shape: f32[8,16,32], index: 0, kind: input, shape index: {}]   ;;  %s6058_s1 = inlined_call_operand.hbm [shape: f32[32,96], index: 1, kind: input, shape index: {}]   ;;  %s6059_s2 = inlined_call_operand.vmem [shape: f32[1,96], index: 2, kind: input, shape index: {}]   ;;  %s6060_s3 = inlined_call_operand.hbm [shape: f32[4,16,16], index: 3, kind: input, shape index: {}]   ;;  %s6061_s4 = inlined_call_operand.hbm [shape: f32[32,32], index: 4, kind: input, shape index: {}]   ;;  %s6062_s5 = inlined_call_operand.vmem [shape: f32[1,32], index: 5, kind: input, shape index: {}]   ;;  %s6063_s6 = inlined_call_operand.hbm [shape: f32[8,16,32], index: 6, kind: output, shape index: {}]  }
   0x1   :  { %13 = vsyncpa [#allocation3 + $0x1], 0 }
   0x2   :  { %14 = vsyncpa [#allocation6], 0 }
   0x3   :  { %15 = vsyncpa [#allocation9], 0 }
   0x4   :  { %16 = vsyncpa [#allocation4], 0 }
   0x5   :  { %18 = vsyncpa [#allocation4 + $0x1], 0  ;;  %s5080_s21 = smov 0   ;;  %s5082_s22 = smov 0  }
   0x6   :  { %s5084_s23 = smov 0   ;;  %s5086_s24 = smov 0  }
   0x7 LB: > { %s5101_s25 = sadd.s32 4294967295, %s5021_s24   ;;  %s4057_s26 = sadd.s32 4294967294, %s5021_s24   ;;  %s5021_s24 = sphi %s5086_s24, %s6090_s24   ;;  %s5017_s23 = sphi %s5084_s23, %s6089_s23   ;;  %s5013_s22 = sphi %s5082_s22, %s6088_s22   ;;  %s5009_s21 = sphi %s5080_s21, %s6087_s21  }
   0x8   : > { %p44_p0 = scmp.ne.s32.totalorder %s5013_s22, %s5009_s21  ;;  %p6064_p1 = scmp.eq.s32.totalorder %s5101_s25, 0 }
   0x9   : > { %p173_p2 = scmp.eq.s32.totalorder %s5101_s25, 1  ;;  %p179_p3 = scmp.eq.s32.totalorder %s4057_s26, 1 }
   0xa   : > { %p5110_p4 = por %p6064_p1, %p44_p0  ;;  %p4058_p5 = scmp.ge.s32.totalorder %s5021_s24, 1 }
   0xb   : > { %p5115_p6 = por %p179_p3, %p44_p0  ;;  %p186_p7 = scmp.lt.s32.totalorder %s5021_s24, 3 }
   0xc   : > { %s6070_s27 = scalar_select %p5110_p4, 1, 0 }
   0xd   : > { %s6071_s28 = scalar_select %p5115_p6, 1, 0 }
   0xe   : > { %p5120_p8 = pnand %p4058_p5, %p186_p7  ;;  %s5023_s30 = smov [#allocation5]  }
   0xf   : > { %s198_s7 = sshll.u32 %s5023_s30, 4  ;;  %s5024_s9 = smov [#allocation7]   ;;  %s199_s7 = int_to_ptr.vmem [resolvable:$true] %s198_s7 }
  0x10   : > { %s6072_s29 = scalar_select %p5120_p8, 1, 0 }
  0x11   : > { %p4637_p9 = pneg %p5120_p8  ;;  %s214_s10 = sshll.u32 %s5024_s9, 4  ;;  %s215_s10 = int_to_ptr.vmem [resolvable:$true] %s214_s10 }
  0x12   : > { %s5025_s11 = smov [#allocation8]   ;;  %s4854_s13 = scalar_lea.vmem %s199_s7, 512 }
  0x13   : > { %p5129_p11 = pnand %p4637_p9, %p6064_p1  ;;  %s227_s12 = sshll.u32 %s5025_s11, 4  ;;  %s228_s12 = int_to_ptr.vmem [resolvable:$true] %s227_s12 }
  0x14   : > { %p4855_p13 = scmp.ne.s32.totalorder %s199_s7, %s4854_s13  ;;  %p4862_p5 = scmp.lt.s32.totalorder %s199_s7, %s199_s7 }
  0x15   : > { %p4845_p12 = pneg %p5129_p11  ;;  %p4863_p7 = scmp.lt.s32.totalorder %s4854_s13, %s4854_s13 }
  0x17   : > { %p4857_p0 = pnand %p4855_p13, %p4845_p12  ;;  %p4864_p9 = por %p4863_p7, %p4862_p5 }
  0x19   : > { %p4858_p3 = pneg %p4857_p0 }
  0x1b   : > { %p4865_p10 = pnand %p4864_p9, %p4858_p3 }
  0x1d   : > { %4868 = shalt.err (!%p4865_p10)
}
  0x1e   : > { %s6065_s14 = smov 128   ;;  %s6066_s15 = smov 8  }
  0x1f   : > { %4640 = dma.hbm_to_vmem [thread:$0]  (!%p5129_p11), %s6058_s1, 512, %s199_s7, [#allocation6], %s6065_s14, %s6065_s14, %s6066_s15  }
  0x20   : > { %s4880_s18 = scalar_lea.vmem %s215_s10, 1024  ;;  %p4888_p3 = scmp.lt.s32.totalorder %s215_s10, %s215_s10 }
  0x21   : > { %p4881_p13 = scmp.ne.s32.totalorder %s215_s10, %s4880_s18  ;;  %p4889_p10 = scmp.lt.s32.totalorder %s4880_s18, %s4880_s18 }
  0x23   : > { %p4883_p0 = pnand %p4881_p13, %p4845_p12  ;;  %p4890_p7 = por %p4889_p10, %p4888_p3 }
  0x25   : > { %p4884_p5 = pneg %p4883_p0 }
  0x27   : > { %p4891_p9 = pnand %p4890_p7, %p4884_p5 }
  0x29   : > { %4894 = shalt.err (!%p4891_p9)
}
  0x2a   : > { %4643 = dma.hbm_to_vmem [thread:$0]  (!%p5129_p11), %s6060_s3, 1024, %s215_s10, [#allocation6], %s6065_s14, %s6065_s14, %s6066_s15  }
  0x2b   : > { %s4906_s26 = scalar_lea.vmem %s228_s12, 512  ;;  %p4914_p3 = scmp.lt.s32.totalorder %s228_s12, %s228_s12 }
  0x2c   : > { %p4907_p1 = scmp.ne.s32.totalorder %s228_s12, %s4906_s26  ;;  %p4915_p5 = scmp.lt.s32.totalorder %s4906_s26, %s4906_s26 }
  0x2e   : > { %p4909_p13 = pnand %p4907_p1, %p4845_p12  ;;  %p4916_p10 = por %p4915_p5, %p4914_p3 }
  0x30   : > { %p4910_p0 = pneg %p4909_p13 }
  0x32   : > { %p4917_p7 = pnand %p4916_p10, %p4910_p0 }
  0x34   : > { %4920 = shalt.err (!%p4917_p7)
}
  0x35   : > { %4646 = dma.hbm_to_vmem [thread:$0]  (!%p5129_p11), %s6061_s4, 512, %s228_s12, [#allocation9], %s6065_s14, %s6065_s14, %s6066_s15  }
  0x36   : > { %s5169_s9 = sadd.s32 1, %s5021_s24   ;;  %s31_s10 = sadd.s32 1, %s5017_s23 }
  0x37   : > { %s28_s8 = ssub.s32 %s5021_s24, %s5169_s9  ;;  %p38_p12 = scmp.ne.s32.totalorder %s5017_s23, %s5013_s22 }
  0x38   : > { %p29_p1 = scmp.eq.s32.totalorder %s28_s8, 0  ;;  %p39_p9 = scmp.eq.s32.totalorder %s5021_s24, 0 }
  0x39   : > { %p4658_p13 = scmp.lt.s32.totalorder %s5021_s24, 2  ;;  %p5183_p3 = por %p173_p2, %p38_p12 }
  0x3a   : > { %s5179_s11 = scalar_select %p29_p1, %s5017_s23, %s31_s10  }
  0x3b   : > { %p40_p0 = por %p39_p9, %p38_p12  ;;  %s244_s16 = sand.u32 1, %s5017_s23  }
  0x3c   : > { %s6074_s13 = scalar_select %p5183_p3, 1, 0 }
  0x3d   : > { %s4194_s17 = sshll.u32 %s5021_s24, 10  ;;  %s4063_s12 = sshll.u32 %s244_s16, 6 }
  0x3e   : > { %s5192_s20 = scalar_lea.hbm %s6057_s0, %s4194_s17  ;;  %s248_s26 = scalar_lea.vmem [#allocation2], %s4063_s12 }
  0x3f   : > { %s256_s30 = sshll.u32 %s248_s26, 4  ;;  %p5194_p11 = pnand %p4658_p13, %p40_p0  ;;  %s5198_s30 = int_to_ptr.vmem [resolvable:$true] %s256_s30 }
  0x40   : > { %s5200_s8 = scalar_lea.sflag [#allocation3], %s244_s16  ;;  %s4921_s10 = scalar_lea.hbm %s5192_s20, 1024 }
  0x41   : > { %p4922_p2 = scmp.ne.s32.totalorder %s5192_s20, %s4921_s10  ;;  %p4923_p5 = pneg %p5194_p11 }
  0x42   : > { %s4926_s12 = scalar_lea.hbm %s6057_s0, 2048  ;;  %p4927_p1 = scmp.lt.s32.totalorder %s5192_s20, %s6057_s0 }
  0x43   : > { %p4924_p10 = pnand %p4923_p5, %p4922_p2  ;;  %p4928_p12 = scmp.lt.s32.totalorder %s4926_s12, %s4921_s10 }
  0x45   : > { %p4925_p7 = pneg %p4924_p10  ;;  %p4929_p9 = por %p4928_p12, %p4927_p1 }
  0x47   : > { %p4930_p13 = pnand %p4929_p9, %p4925_p7 }
  0x49   : > { %4933 = shalt.err (!%p4930_p13)
}
  0x4a   : > { %s4934_s16 = scalar_lea.vmem %s5198_s30, 1024  ;;  %s5028_s14 = smov [#allocation2]  }
  0x4b   : > { %p4935_p0 = scmp.ne.s32.totalorder %s5198_s30, %s4934_s16  ;;  %s4939_s15 = sshll.u32 %s5028_s14, 4  ;;  %s4940_s15 = int_to_ptr.vmem [resolvable:$false] %s4939_s15 }
  0x4c   : > { %s4941_s17 = scalar_lea.vmem %s4940_s15, 2048  ;;  %p4942_p10 = scmp.lt.s32.totalorder %s5198_s30, %s4940_s15 }
  0x4d   : > { %p4937_p6 = pnand %p4935_p0, %p4923_p5  ;;  %p4943_p3 = scmp.lt.s32.totalorder %s4941_s17, %s4934_s16 }
  0x4f   : > { %p4938_p2 = pneg %p4937_p6  ;;  %p4944_p4 = por %p4943_p3, %p4942_p10 }
  0x51   : > { %p4945_p8 = pnand %p4944_p4, %p4938_p2 }
  0x53   : > { %4948 = shalt.err (!%p4945_p8)
}
  0x54   : > { %s6076_s10 = smov 8   ;;  %s6077_s18 = smov 128  }
  0x55   : > { %4650 = dma.hbm_to_vmem [thread:$0]  (!%p5194_p11), %s5192_s20, 1024, %s5198_s30, %s5200_s8, %s6077_s18, %s6077_s18, %s6076_s10  }
  0x56   : > { %p6078_p6 = scmp.ne.s32.totalorder %s6072_s29, 0 }
  0x57   : > { %s5227_s14 = sand.u32 (!%p6078_p6), 1, %s5013_s22   ;;  %p6079_p4 = scmp.ne.s32.totalorder (!%p6078_p6), %s6070_s27, 0 }
  0x58   : > { %268 = sbr.rel (%p6078_p6) target bundleno = 3268 (0xcc4), region = 44  ;;  %s4068_s15 = sshll.u32 (!%p6078_p6), %s5227_s14, 6 }
  0x59   : > { %s271_s12 = scalar_lea.sflag (!%p6078_p6), [#allocation3], %s5227_s14  ;;  %s5233_s7 = scalar_lea.vmem (!%p6078_p6), [#allocation2], %s4068_s15 }
  0x5d   : > { %4992 = dma.done.wait (%p6079_p4), %s271_s12, 1024  }
  0x5e   : > { %4994 = vsyncadd (%p6079_p4), %s271_s12, 4294966272  ;;  %p6080_p8 = scmp.eq.s32.totalorder %s5101_s25, 0 }
  0x60   : > { %4996 = dma.done.wait (%p6080_p8), [#allocation6], 1536   ;;  %p6081_p3 = pmov %p6080_p8 }
  0x62   : > { %4998 = vsyncadd (%p6081_p3), [#allocation6], 4294965760  ;;  %p6082_p11 = pmov %p6081_p3 }
  0x63   : > { %p6083_p5 = pmov %p6081_p3 }
  0x64   : > { %5000 = dma.done.wait (%p6082_p11), [#allocation9], 512  }
  0x65   : > { %5002 = vsyncadd (%p6083_p5), [#allocation9], 4294966784  ;;  %vm336_vm0 = vcmask 261120   ;;  %v328_v0 = vld [vmem:[#allocation5 + $0x18] sm:$0xff]  ;;  %v327_v1 = vld [vmem:[#allocation5 + $0x10] sm:$0xff]  ;;  %vm474_vm1 = vcmask 64512  }
  0x66   : > { %4349 = vmatprep.subr.mxu0 %v328_v0  ;;  %v317_v2 = vld [vmem:[%s5233_s7] sm:$0xff]  ;;  %4613 = vmatprep.subr.mxu1 %v328_v0  ;;  %v326_v3 = vld [vmem:[#allocation5 + $0x8] sm:$0xff]  ;;  %v319_v6 = vld [vmem:[%s5233_s7 + $0x10] sm:$0xff]  ;;  %s5029_s20 = smov 96   ;;  %s5030_s30 = smov 64   ;;  %vm825_vm2 = vcmask 130048  }
  0x67   : > { %4350 = vmatpush3.msra.mxu0 %v328_v0  ;;  %4357 = vmatprep.mubr.msk.f32.mxu0 %vm336_vm0, %v317_v2  ;;  %v325_v4 = vld [vmem:[#allocation5] sm:$0xff]  ;;  %v318_v5 = vld [vmem:[%s5233_s7 + $0x8] sm:$0xff]  ;;  %v323_v9 = vld [vmem:[%s5233_s7 + $0x30] sm:$0xff]  ;;  %s5031_s8 = smov 88   ;;  %s5032_s19 = smov 120   ;;  %vm3783_vm3 = vcmask 195584  }
  0x68   : > { %4351 = vmatprep.subr.mxu0 %v327_v1  ;;  %4617 = vmatpush3.msra.mxu1 %v328_v0  ;;  %v321_v7 = vld [vmem:[%s5233_s7 + $0x20] sm:$0xff]  ;;  %v322_v8 = vld [vmem:[%s5233_s7 + $0x28] sm:$0xff]  ;;  %v320_v10 = vld [vmem:[%s5233_s7 + $0x18] sm:$0xff]  ;;  %s5033_s26 = smov 56   ;;  %s5034_s16 = smov 80  }
  0x69   : > { %4352 = vmatpush3.msra.mxu0 %v327_v1  ;;  %4614 = vmatprep.subr.mxu1 %v327_v1  ;;  %v324_v11 = vld [vmem:[%s5233_s7 + $0x38] sm:$0xff]  ;;  %v4073_v12 = vld [vmem:[%s6059_s2] ss:$0 sm:$0xff]  ;;  %v467_v38 = vld [vmem:[#allocation7 + $0x8] sm:$0xff]  ;;  %s5035_s17 = smov 112   ;;  %s5036_s10 = smov 48  }
  0x6a   : > { %4353 = vmatprep.subr.mxu0 %v326_v3  ;;  %4618 = vmatpush3.msra.mxu1 %v327_v1  ;;  %v466_v44 = vld [vmem:[#allocation7] sm:$0xff]  ;;  %s5037_s18 = smov 72   ;;  %s5038_s12 = smov 104  }
  0x6b   : > { %4354 = vmatpush3.msra.mxu0 %v326_v3  ;;  %4615 = vmatprep.subr.mxu1 %v326_v3  ;;  %s5039_s7 = smov 40   ;;  %s5040_s27 = smov 8  }
  0x6c   : > { %4355 = vmatprep.subr.mxu0 %v325_v4  ;;  %4619 = vmatpush3.msra.mxu1 %v326_v3  ;;  %s5041_s29 = smov 16   ;;  %p6084_p1 = scmp.ne.s32.totalorder %s6074_s13, 0 }
  0x6d   : > { %4356 = vmatpush3.msra.mxu0 %v325_v4  ;;  %4616 = vmatprep.subr.mxu1 %v325_v4 }
  0x6e   : > { %4358 = vmatmul.mubr.msk.f32.vlgmr.msra.gmra.mxu0 %vm336_vm0, %v318_v5  ;;  %4620 = vmatpush3.msra.mxu1 %v325_v4 }
  0x6f   : > { %4360 = vmatprep.mubr.msk.f32.mxu0 %vm336_vm0, %v319_v6  ;;  %4363 = vmatprep.mubr.msk.f32.mxu1 %vm336_vm0, %v321_v7 }
  0x70   : > { %4364 = vmatmul.mubr.msk.f32.vlgmr.msra.gmra.mxu1 %vm336_vm0, %v322_v8 }
  0x71   : > { %4366 = vmatprep.mubr.msk.f32.mxu1 %vm336_vm0, %v323_v9 }
  0x72   : > { %4361 = vmatmul.mubr.msk.f32.gmra.mxu0 %vm336_vm0, %v320_v10 }
  0x74   : > { %4367 = vmatmul.mubr.msk.f32.gmra.mxu1 %vm336_vm0, %v324_v11 }
 0x12e   : > { %v4359_v13 = vpop.f32.mrf.mxu0 }
 0x12f   : > { %v5266_v14 = vadd.f32 %v4359_v13, %v4073_v12 }
 0x130   : > { %v427_v15 = vpop.f32.mrf.mxu0  ;;  %v4365_v16 = vpop.f32.mrf.mxu1 }
 0x131   : > { %v5268_v17 = vadd.f32 %v4073_v12, %v427_v15  ;;  %472 = vrot.lane.b32.xlu0 %v5266_v14, %s5029_s20  ;;  %v5281_v24 = vadd.f32 %v4365_v16, %v4073_v12 }
 0x132   : > { %v4362_v18 = vpop.f32.mrf.mxu0  ;;  %v447_v19 = vpop.f32.mrf.mxu1 }
 0x133   : > { %v5271_v20 = vadd.f32 %v4362_v18, %v4073_v12  ;;  %4373 = vmatprep.mubr.msk.f32.mxu1 %vm474_vm1, %v5268_v17  ;;  %v5275_v22 = vadd.f32 %v4073_v12, %v447_v19 }
 0x134   : > { %v437_v21 = vpop.f32.mrf.mxu0  ;;  %v4368_v25 = vpop.f32.mrf.mxu1 }
 0x135   : > { %562 = vrot.lane.b32.xlu1 %v5271_v20, %s5029_s20  ;;  %470 = vrot.lane.b32.xlu0 %v5268_v17, %s5029_s20  ;;  %v5279_v23 = vadd.f32 %v4073_v12, %v437_v21  ;;  %v5287_v26 = vadd.f32 %v4368_v25, %v4073_v12 }
 0x136   : > { %4387 = vmatprep.mubr.msk.f32.mxu0 %vm474_vm1, %v5275_v22  ;;  %v457_v27 = vpop.f32.mrf.mxu1 }
 0x137   : > { %v5290_v28 = vadd.f32 %v4073_v12, %v457_v27 }
 0x139   : > { %560 = vrot.lane.b32.xlu1 %v5279_v23, %s5029_s20  ;;  %651 = vrot.lane.b32.xlu0 %v5281_v24, %s5029_s20 }
 0x13d   : > { %649 = vrot.lane.b32.xlu1 %v5275_v22, %s5029_s20  ;;  %740 = vrot.lane.b32.xlu0 %v5287_v26, %s5029_s20 }
 0x141   : > { %738 = vrot.lane.b32.xlu1 %v5290_v28, %s5029_s20  ;;  %s5042_s20 = smov 24  }
 0x145   : > { %916 = vrot.lane.b32.xlu1 %v5266_v14, %s5030_s30 }
 0x1a3   : > { %v473_v29 = vpop.permute.xlu0 %472 }
 0x1a4   : > { %4369 = vmatprep.subr.msk.mxu1 %vm474_vm1, %v473_v29 }
 0x1a5   : > { %4370 = vmatpush3.xpose.msk.msra.mxu1 %vm474_vm1, %v473_v29 }
 0x1a7   : > { %v563_v30 = vpop.permute.xlu1 %562  ;;  %v471_v31 = vpop.permute.xlu0 %470 }
 0x1a8   : > { %4371 = vmatprep.subr.msk.mxu1 %vm474_vm1, %v471_v31 }
 0x1a9   : > { %4372 = vmatpush3.xpose.msk.msra.mxu1 %vm474_vm1, %v471_v31 }
 0x1aa   : > { %4376 = vmatprep.subr.msk.mxu1 %vm474_vm1, %v563_v30 }
 0x1ab   : > { %v561_v32 = vpop.permute.xlu1 %560  ;;  %v652_v33 = vpop.permute.xlu0 %651 }
 0x1ac   : > { %4374 = vmatmul.mubr.msk.f32.vlgmr.msra.gmra.mxu1 %vm474_vm1, %v5266_v14  ;;  %4383 = vmatprep.subr.msk.mxu0 %vm474_vm1, %v652_v33 }
 0x1ad   : > { %4377 = vmatpush3.xpose.msk.msra.mxu1 %vm474_vm1, %v563_v30  ;;  %4380 = vmatprep.mubr.msk.f32.mxu1 %vm474_vm1, %v5279_v23 }
 0x1ae   : > { %4384 = vmatpush3.xpose.msk.msra.mxu0 %vm474_vm1, %v652_v33  ;;  %4378 = vmatprep.subr.msk.mxu1 %vm474_vm1, %v561_v32 }
 0x1af   : > { %v650_v34 = vpop.permute.xlu1 %649  ;;  %v741_v35 = vpop.permute.xlu0 %740 }
 0x1b0   : > { %4385 = vmatprep.subr.msk.mxu0 %vm474_vm1, %v650_v34 }
 0x1b1   : > { %4379 = vmatpush3.xpose.msk.msra.mxu1 %vm474_vm1, %v561_v32 }
 0x1b2   : > { %4386 = vmatpush3.xpose.msk.msra.mxu0 %vm474_vm1, %v650_v34  ;;  %4390 = vmatprep.subr.msk.mxu1 %vm474_vm1, %v741_v35 }
 0x1b3   : > { %v739_v36 = vpop.permute.xlu1 %738 }
 0x1b4   : > { %4381 = vmatmul.mubr.msk.f32.vlgmr.msra.gmra.mxu1 %vm474_vm1, %v5271_v20 }
 0x1b5   : > { %4388 = vmatmul.mubr.msk.f32.vlgmr.msra.gmra.mxu0 %vm474_vm1, %v5281_v24  ;;  %4391 = vmatpush3.xpose.msk.msra.mxu1 %vm474_vm1, %v741_v35 }
 0x1b6   : > { %4394 = vmatprep.mubr.msk.f32.mxu1 %vm474_vm1, %v5290_v28  ;;  %4392 = vmatprep.subr.msk.mxu1 %vm474_vm1, %v739_v36 }
 0x1b7   : > { %v917_v37 = vpop.permute.xlu1 %916 }
 0x1b8   : > { %4397 = vmatprep.subr.mxu0 %v917_v37 }
 0x1b9   : > { %4393 = vmatpush3.xpose.msk.msra.mxu1 %vm474_vm1, %v739_v36  ;;  %4398 = vmatpush3.msra.mxu0 %v917_v37 }
 0x1bc   : > { %4395 = vmatmul.mubr.msk.f32.vlgmr.msra.gmra.mxu1 %vm474_vm1, %v5287_v26 }
 0x26c   : > { %v4375_v39 = vpop.f32.mrf.mxu1 }
 0x26d   : > { %v555_v40 = vadd.f32 %v4375_v39, %v467_v38 }
 0x26e   : > { %v549_v42 = vpop.f32.mrf.mxu1 }
 0x26f   : > { %v829_v41 = vsel %vm825_vm2, %v555_v40, -inf  ;;  %v550_v49 = vadd.f32 %v549_v42, %v466_v44 }
 0x270   : > { %830 = vmax.xlane.f32.xlu1 %v829_v41 }
 0x271   : > { %v826_v53 = vsel %vm825_vm2, %v550_v49, -inf }
 0x274   : > { %v4382_v43 = vpop.f32.mrf.mxu1 }
 0x275   : > { %v644_v45 = vadd.f32 %v4382_v43, %v467_v38  ;;  %v4389_v46 = vpop.f32.mrf.mxu0 }
 0x276   : > { %v733_v47 = vadd.f32 %v4389_v46, %v467_v38  ;;  %v638_v54 = vpop.f32.mrf.mxu1 }
 0x277   : > { %v835_v48 = vsel %vm825_vm2, %v644_v45, -inf  ;;  %v727_v51 = vpop.f32.mrf.mxu0  ;;  %v639_v55 = vadd.f32 %v638_v54, %v466_v44 }
 0x278   : > { %v841_v50 = vsel %vm825_vm2, %v733_v47, -inf  ;;  %836 = vmax.xlane.f32.xlu1 %v835_v48  ;;  %v728_v52 = vadd.f32 %v727_v51, %v466_v44 }
 0x279   : > { %842 = vmax.xlane.f32.xlu0 %v841_v50  ;;  %v832_v59 = vsel %vm825_vm2, %v639_v55, -inf }
 0x27a   : > { %v838_v56 = vsel %vm825_vm2, %v728_v52, -inf }
 0x27c   : > { %v4396_v57 = vpop.f32.mrf.mxu1 }
 0x27d   : > { %827 = vmax.xlane.f32.xlu0 %v826_v53  ;;  %v822_v58 = vadd.f32 %v4396_v57, %v467_v38 }
 0x27e   : > { %v816_v61 = vpop.f32.mrf.mxu1 }
 0x27f   : > { %v847_v60 = vsel %vm825_vm2, %v822_v58, -inf  ;;  %v5359_v62 = vadd.f32 %v816_v61, %v466_v44 }
 0x281   : > { %839 = vmax.xlane.f32.xlu0 %v838_v56  ;;  %v844_v63 = vsel %vm825_vm2, %v5359_v62, -inf }
 0x285   : > { %833 = vmax.xlane.f32.xlu0 %v832_v59 }
 0x289   : > { %848 = vmax.xlane.f32.xlu0 %v847_v60  ;;  %1003 = vrot.lane.b32.xlu1 %v5271_v20, %s5030_s30 }
 0x28d   : > { %1090 = vrot.lane.b32.xlu1 %v5281_v24, %s5030_s30 }
 0x291   : > { %1088 = vrot.lane.b32.xlu1 %v5275_v22, %s5030_s30 }
 0x295   : > { %1271 = vrot.lane.b32.xlu1 %v5266_v14, %s5031_s8 }
 0x299   : > { %1269 = vrot.lane.b32.xlu1 %v5268_v17, %s5031_s8 }
 0x29d   : > { %1265 = vrot.lane.b32.xlu1 %v5268_v17, %s5032_s19 }
 0x29f   : > { %914 = vrot.lane.b32.xlu0 %v5268_v17, %s5030_s30 }
 0x2a1   : > { %1453 = vrot.lane.b32.xlu1 %v5281_v24, %s5031_s8 }
 0x2a3   : > { %1001 = vrot.lane.b32.xlu0 %v5279_v23, %s5030_s30 }
 0x2a7   : > { %1177 = vrot.lane.b32.xlu0 %v5287_v26, %s5030_s30 }
 0x2ab   : > { %1175 = vrot.lane.b32.xlu0 %v5290_v28, %s5030_s30 }
 0x2af   : > { %1362 = vrot.lane.b32.xlu0 %v5271_v20, %s5031_s8 }
 0x2b3   : > { %1360 = vrot.lane.b32.xlu0 %v5279_v23, %s5031_s8 }
 0x2b7   : > { %1267 = vrot.lane.b32.xlu0 %v5266_v14, %s5032_s19 }
 0x2c5   : > { %845 = vmax.xlane.f32.xlu1 %v844_v63 }
 0x2d6   : > { %1356 = vrot.lane.b32.xlu1 %v5279_v23, %s5032_s19 }
 0x2f9   : > { %v831_v0 = vpop.xlane.xlu1 %830 }
 0x2fa   : > { %v851_v1 = vsub.f32 %v555_v40, %v831_v0 }
 0x2fc   : > { %v860_v2 = vmul.f32 1.442695, %v851_v1 }
 0x2fe   : > { %4715 = vpow2.f32 %v860_v2 }
 0x301   : > { %v837_v3 = vpop.xlane.xlu1 %836 }
 0x302   : > { %v843_v4 = vpop.xlane.xlu0 %842  ;;  %v853_v7 = vsub.f32 %v644_v45, %v837_v3 }
 0x303   : > { %v855_v5 = vsub.f32 %v733_v47, %v843_v4 }
 0x304   : > { %v864_v11 = vmul.f32 1.442695, %v853_v7 }
 0x305   : > { %v868_v6 = vmul.f32 1.442695, %v855_v5  ;;  %v1004_v8 = vpop.permute.xlu1 %1003 }
 0x306   : > { %v828_v9 = vpop.xlane.xlu0 %827  ;;  %4404 = vmatprep.subr.mxu1 %v1004_v8 }
 0x307   : > { %4717 = vpow2.f32 %v868_v6  ;;  %v850_v10 = vsub.f32 %v550_v49, %v828_v9  ;;  %4405 = vmatpush3.msra.mxu1 %v1004_v8 }
 0x309   : > { %v858_v12 = vmul.f32 1.442695, %v850_v10  ;;  %v5375_v36 = vpop.permute.xlu1 %1090 }
 0x30a   : > { %v840_v13 = vpop.xlane.xlu0 %839 }
 0x30b   : > { %v5365_v15 = vpop.eup %4715  ;;  %4719 = vpow2.f32 %v858_v12  ;;  %v854_v16 = vsub.f32 %v728_v52, %v840_v13 }
 0x30c   : > { %v877_v18 = vsel %vm825_vm2, %v5365_v15, 0.0  ;;  %4721 = vpow2.f32 %v864_v11 }
 0x30d   : > { %v866_v19 = vmul.f32 1.442695, %v854_v16  ;;  %878 = vadd.xlane.f32.xlu0 %v877_v18  ;;  %v1089_v48 = vpop.permute.xlu1 %1088 }
 0x30e   : > { %v834_v21 = vpop.xlane.xlu0 %833 }
 0x30f   : > { %4723 = vpow2.f32 %v866_v19  ;;  %v852_v25 = vsub.f32 %v639_v55, %v834_v21 }
 0x311   : > { %v862_v27 = vmul.f32 1.442695, %v852_v25  ;;  %v1272_v49 = vpop.permute.xlu1 %1271 }
 0x312   : > { %v849_v29 = vpop.xlane.xlu0 %848 }
 0x313   : > { %4725 = vpow2.f32 %v862_v27  ;;  %v857_v30 = vsub.f32 %v822_v58, %v849_v29 }
 0x314   : > { %v5369_v31 = vpop.eup %4717 }
 0x315   : > { %v872_v32 = vmul.f32 1.442695, %v857_v30  ;;  %v889_v33 = vsel %vm825_vm2, %v5369_v31, 0.0  ;;  %v1270_v50 = vpop.permute.xlu1 %1269 }
 0x316   : > { %890 = vadd.xlane.f32.xlu0 %v889_v33  ;;  %v915_v34 = vpop.permute.xlu0 %914 }
 0x317   : > { %4727 = vpow2.f32 %v872_v32  ;;  %4399 = vmatprep.subr.mxu0 %v915_v34 }
 0x318   : > { %v5373_v35 = vpop.eup %4719  ;;  %4400 = vmatpush3.msra.mxu0 %v915_v34 }
 0x319   : > { %4411 = vmatprep.subr.mxu0 %v5375_v36  ;;  %v874_v37 = vsel %vm825_vm2, %v5373_v35, 0.0  ;;  %v5380_v38 = vpop.eup %4721  ;;  %v1266_v51 = vpop.permute.xlu1 %1265 }
 0x31a   : > { %875 = vadd.xlane.f32.xlu1 %v874_v37  ;;  %v1002_v39 = vpop.permute.xlu0 %1001  ;;  %v883_v41 = vsel %vm825_vm2, %v5380_v38, 0.0 }
 0x31b   : > { %4406 = vmatprep.subr.mxu1 %v1002_v39 }
 0x31c   : > { %v5382_v40 = vpop.eup %4723  ;;  %4407 = vmatpush3.msra.mxu1 %v1002_v39 }
 0x31d   : > { %v886_v42 = vsel %vm825_vm2, %v5382_v40, 0.0  ;;  %v5409_v52 = vpop.permute.xlu1 %1453 }
 0x31e   : > { %884 = vadd.xlane.f32.xlu1 %v883_v41  ;;  %887 = vadd.xlane.f32.xlu0 %v886_v42  ;;  %v5388_v43 = vpop.permute.xlu0 %1177 }
 0x31f   : > { %4418 = vmatprep.subr.mxu1 %v5388_v43 }
 0x320   : > { %v5391_v44 = vpop.eup %4725 }
 0x321   : > { %v880_v45 = vsel %vm825_vm2, %v5391_v44, 0.0 }
 0x322   : > { %881 = vadd.xlane.f32.xlu1 %v880_v45  ;;  %v1176_v58 = vpop.permute.xlu0 %1175 }
 0x324   : > { %v5395_v46 = vpop.eup %4727 }
 0x325   : > { %v895_v47 = vsel %vm825_vm2, %v5395_v46, 0.0 }
 0x326   : > { %896 = vadd.xlane.f32.xlu0 %v895_v47  ;;  %v5424_v59 = vpop.permute.xlu0 %1362 }
 0x32a   : > { %v5426_v60 = vpop.permute.xlu0 %1360 }
 0x32e   : > { %v1268_v61 = vpop.permute.xlu0 %1267 }
 0x333   : > { %1544 = vrot.lane.b32.xlu1 %v5287_v26, %s5031_s8 }
 0x33c   : > { %1451 = vrot.lane.b32.xlu0 %v5275_v22, %s5031_s8 }
 0x340   : > { %1358 = vrot.lane.b32.xlu0 %v5271_v20, %s5032_s19 }
 0x344   : > { %1449 = vrot.lane.b32.xlu0 %v5281_v24, %s5032_s19 }
 0x348   : > { %1538 = vrot.lane.b32.xlu0 %v5290_v28, %s5032_s19 }
 0x34e   : > { %v846_v53 = vpop.xlane.xlu1 %845 }
 0x34f   : > { %v856_v54 = vsub.f32 %v5359_v62, %v846_v53 }
 0x351   : > { %v870_v55 = vmul.f32 1.442695, %v856_v54 }
 0x352   : > { %v5428_v62 = vpop.permute.xlu1 %1356 }
 0x353   : > { %4729 = vpow2.f32 %v870_v55 }
 0x360   : > { %v5412_v56 = vpop.eup %4729 }
 0x361   : > { %v892_v57 = vsel %vm825_vm2, %v5412_v56, 0.0 }
 0x362   : > { %893 = vadd.xlane.f32.xlu1 %v892_v57 }
 0x373   : > { %1447 = vrot.lane.b32.xlu1 %v5275_v22, %s5032_s19 }
 0x377   : > { %1542 = vrot.lane.b32.xlu1 %v5290_v28, %s5031_s8 }
 0x37b   : > { %1540 = vrot.lane.b32.xlu1 %v5287_v26, %s5032_s19  ;;  %s314_s19 = scalar_lea.vmem [#allocation10], %s4068_s15  ;;  %s4196_s15 = sshll.u32 %s5101_s25, 10 }
 0x37c   : > { %s3941_s25 = scalar_lea.sflag [#allocation4], %s5227_s14 }
 0x37f   : > { %1719 = vrot.lane.b32.xlu1 %v5266_v14, %s5033_s26 }
 0x396   : > { %v879_v63 = vpop.xlane.xlu0 %878 }
 0x397   : > { %4731 = vrcp.f32 %v879_v63 }
 0x39f   : > { %v891_v0 = vpop.xlane.xlu0 %890 }
 0x3a3   : > { %v876_v1 = vpop.xlane.xlu1 %875 }
 0x3a4   : > { %4733 = vrcp.f32 %v876_v1  ;;  %v4732_v5 = vpop.eup %4731 }
 0x3a5   : > { %4735 = vrcp.f32 %v891_v0  ;;  %v907_v8 = vmul.f32 %v4732_v5, %v5365_v15 }
 0x3a7   : > { %v885_v2 = vpop.xlane.xlu1 %884  ;;  %v888_v3 = vpop.xlane.xlu0 %887 }
 0x3a8   : > { %4737 = vrcp.f32 %v888_v3 }
 0x3a9   : > { %4739 = vrcp.f32 %v885_v2 }
 0x3ab   : > { %v882_v4 = vpop.xlane.xlu1 %881 }
 0x3ac   : > { %4741 = vrcp.f32 %v882_v4 }
 0x3af   : > { %v897_v19 = vpop.xlane.xlu0 %896  ;;  %v1545_v25 = vpop.permute.xlu1 %1544 }
 0x3b0   : > { %4743 = vrcp.f32 %v897_v19 }
 0x3b1   : > { %v4734_v6 = vpop.eup %4733 }
 0x3b2   : > { %v906_v7 = vmul.f32 %v4734_v6, %v5373_v35  ;;  %v4736_v9 = vpop.eup %4735 }
 0x3b3   : > { %v911_v13 = vmul.f32 %v4736_v9, %v5369_v31  ;;  %v1452_v21 = vpop.permute.xlu0 %1451 }
 0x3b4   : > { %4401 = vmatprep.mubr.msk.f32.mxu0 %vm825_vm2, %v906_v7 }
 0x3b5   : > { %4402 = vmatmul.mubr.msk.f32.vlgmr.msra.gmra.mxu0 %vm825_vm2, %v907_v8  ;;  %v4738_v10 = vpop.eup %4737 }
 0x3b6   : > { %4412 = vmatpush3.msra.mxu0 %v5375_v36  ;;  %v910_v11 = vmul.f32 %v4738_v10, %v5382_v40  ;;  %v4740_v12 = vpop.eup %4739 }
 0x3b7   : > { %4413 = vmatprep.subr.mxu0 %v1089_v48  ;;  %v909_v18 = vmul.f32 %v4740_v12, %v5380_v38  ;;  %v1359_v27 = vpop.permute.xlu0 %1358 }
 0x3b8   : > { %4414 = vmatpush3.msra.mxu0 %v1089_v48  ;;  %4415 = vmatprep.mubr.msk.f32.mxu0 %vm825_vm2, %v910_v11 }
 0x3b9   : > { %v4742_v16 = vpop.eup %4741  ;;  %4425 = vmatprep.subr.msk.mxu0 %vm474_vm1, %v1272_v49  ;;  %4416 = vmatmul.mubr.msk.f32.vlgmr.msra.gmra.mxu0 %vm825_vm2, %v911_v13 }
 0x3ba   : > { %v908_v15 = vmul.f32 %v4742_v16, %v5391_v44  ;;  %4426 = vmatpush3.xpose.msk.msra.mxu0 %vm474_vm1, %v1272_v49  ;;  %4429 = vmatprep.mubr.msk.f32.mxu0 %vm474_vm1, %v1266_v51  ;;  %v1264_v44 = vld [vmem:[#allocation7 + $0x18] sm:$0xff] }
 0x3bb   : > { %4427 = vmatprep.subr.msk.mxu0 %vm474_vm1, %v1270_v50  ;;  %v1450_v31 = vpop.permute.xlu0 %1449 }
 0x3bc   : > { %4408 = vmatprep.mubr.msk.f32.mxu1 %vm825_vm2, %v908_v15 }
 0x3bd   : > { %4409 = vmatmul.mubr.msk.f32.vlgmr.msra.gmra.mxu1 %vm825_vm2, %v909_v18  ;;  %v4744_v34 = vpop.eup %4743 }
 0x3be   : > { %4419 = vmatpush3.msra.mxu1 %v5388_v43  ;;  %4428 = vmatpush3.xpose.msk.msra.mxu0 %vm474_vm1, %v1270_v50  ;;  %v913_v38 = vmul.f32 %v4744_v34, %v5395_v46  ;;  %v1263_v46 = vld [vmem:[#allocation7 + $0x10] sm:$0xff] }
 0x3bf   : > { %4420 = vmatprep.subr.mxu1 %v1176_v58  ;;  %4439 = vmatprep.subr.msk.mxu0 %vm474_vm1, %v5409_v52  ;;  %v1539_v39 = vpop.permute.xlu0 %1538 }
 0x3c0   : > { %4421 = vmatpush3.msra.mxu1 %v1176_v58 }
 0x3c1   : > { %4432 = vmatprep.subr.msk.mxu1 %vm474_vm1, %v5424_v59  ;;  %4430 = vmatmul.mubr.msk.f32.vlgmr.msra.gmra.mxu0 %vm474_vm1, %v1268_v61 }
 0x3c2   : > { %4440 = vmatpush3.xpose.msk.msra.mxu0 %vm474_vm1, %v5409_v52 }
 0x3c3   : > { %4441 = vmatprep.subr.msk.mxu0 %vm474_vm1, %v1452_v21 }
 0x3c6   : > { %4442 = vmatpush3.xpose.msk.msra.mxu0 %vm474_vm1, %v1452_v21 }
 0x3eb   : > { %v894_v29 = vpop.xlane.xlu1 %893 }
 0x3ec   : > { %4745 = vrcp.f32 %v894_v29 }
 0x3ef   : > { %v1448_v30 = vpop.permute.xlu1 %1447 }
 0x3f0   : > { %4443 = vmatprep.mubr.msk.f32.mxu0 %vm474_vm1, %v1448_v30 }
 0x3f1   : > { %4444 = vmatmul.mubr.msk.f32.vlgmr.msra.gmra.mxu0 %vm474_vm1, %v1450_v31 }
 0x3f3   : > { %v1543_v32 = vpop.permute.xlu1 %1542 }
 0x3f7   : > { %v1541_v33 = vpop.permute.xlu1 %1540 }
 0x3f9   : > { %v4746_v35 = vpop.eup %4745 }
 0x3fa   : > { %v912_v36 = vmul.f32 %v4746_v35, %v5412_v56 }
 0x3fb   : > { %v1720_v37 = vpop.permute.xlu1 %1719 }
 0x3fc   : > { %4422 = vmatprep.mubr.msk.f32.mxu1 %vm825_vm2, %v912_v36  ;;  %4453 = vmatprep.subr.mxu0 %v1720_v37 }
 0x3fd   : > { %4423 = vmatmul.mubr.msk.f32.vlgmr.msra.gmra.mxu1 %vm825_vm2, %v913_v38  ;;  %4454 = vmatpush3.msra.mxu0 %v1720_v37 }
 0x3fe   : > { %4433 = vmatpush3.xpose.msk.msra.mxu1 %vm474_vm1, %v5424_v59  ;;  %4436 = vmatprep.mubr.msk.f32.mxu1 %vm474_vm1, %v5428_v62 }
 0x3ff   : > { %4434 = vmatprep.subr.msk.mxu1 %vm474_vm1, %v5426_v60 }
 0x402   : > { %4435 = vmatpush3.xpose.msk.msra.mxu1 %vm474_vm1, %v5426_v60 }
 0x403   : > { %4446 = vmatprep.subr.msk.mxu1 %vm474_vm1, %v1545_v25 }
 0x405   : > { %4437 = vmatmul.mubr.msk.f32.vlgmr.msra.gmra.mxu1 %vm474_vm1, %v1359_v27 }
 0x406   : > { %4447 = vmatpush3.xpose.msk.msra.mxu1 %vm474_vm1, %v1545_v25  ;;  %4450 = vmatprep.mubr.msk.f32.mxu1 %vm474_vm1, %v1539_v39 }
 0x407   : > { %4448 = vmatprep.subr.msk.mxu1 %vm474_vm1, %v1543_v32 }
 0x40a   : > { %4449 = vmatpush3.xpose.msk.msra.mxu1 %vm474_vm1, %v1543_v32 }
 0x40d   : > { %4451 = vmatmul.mubr.msk.f32.vlgmr.msra.gmra.mxu1 %vm474_vm1, %v1541_v33 }
 0x475   : > { %v5479_v40 = vpop.f32.mrf.mxu0 }
 0x477   : > { %v5481_v41 = vpop.f32.mrf.mxu0 }
 0x479   : > { %v5483_v42 = vpop.f32.mrf.mxu0 }
 0x47b   : > { %v5485_v43 = vpop.f32.mrf.mxu0 }
 0x47d   : > { %v5491_v58 = vpop.f32.mrf.mxu1 }
 0x47f   : > { %v5493_v59 = vpop.f32.mrf.mxu1 }
 0x481   : > { %v4431_v45 = vpop.f32.mrf.mxu0 }
 0x482   : > { %v1353_v47 = vadd.f32 %v4431_v45, %v1264_v44 }
 0x483   : > { %v1347_v48 = vpop.f32.mrf.mxu0 }
 0x484   : > { %v1348_v49 = vadd.f32 %v1347_v48, %v1263_v46  ;;  %v1632_v50 = vsel %vm825_vm2, %v1353_v47, -inf }
 0x485   : > { %1633 = vmax.xlane.f32.xlu1 %v1632_v50 }
 0x486   : > { %v1629_v51 = vsel %vm825_vm2, %v1348_v49, -inf }
 0x487   : > { %1630 = vmax.xlane.f32.xlu0 %v1629_v51 }
 0x4b1   : > { %v4445_v52 = vpop.f32.mrf.mxu0 }
 0x4b2   : > { %v1535_v53 = vadd.f32 %v4445_v52, %v1264_v44 }
 0x4b3   : > { %v1529_v54 = vpop.f32.mrf.mxu0 }
 0x4b4   : > { %v1530_v55 = vadd.f32 %v1529_v54, %v1263_v46  ;;  %v1644_v56 = vsel %vm825_vm2, %v1535_v53, -inf }
 0x4b5   : > { %1645 = vmax.xlane.f32.xlu0 %v1644_v56 }
 0x4b6   : > { %v1641_v57 = vsel %vm825_vm2, %v1530_v55, -inf }
 0x4b9   : > { %1642 = vmax.xlane.f32.xlu0 %v1641_v57 }
 0x4bd   : > { %v5495_v60 = vpop.f32.mrf.mxu1 }
 0x4bf   : > { %v5497_v61 = vpop.f32.mrf.mxu1 }
 0x4c5   : > { %v4438_v62 = vpop.f32.mrf.mxu1 }
 0x4c6   : > { %v1444_v63 = vadd.f32 %v4438_v62, %v1264_v44 }
 0x4c7   : > { %v1438_v0 = vpop.f32.mrf.mxu1 }
 0x4c8   : > { %v5499_v1 = vadd.f32 %v1438_v0, %v1263_v46  ;;  %v1638_v2 = vsel %vm825_vm2, %v1444_v63, -inf }
 0x4c9   : > { %1639 = vmax.xlane.f32.xlu1 %v1638_v2 }
 0x4ca   : > { %v1635_v3 = vsel %vm825_vm2, %v5499_v1, -inf }
 0x4cb   : > { %1636 = vmax.xlane.f32.xlu0 %v1635_v3 }
 0x4cd   : > { %v4452_v4 = vpop.f32.mrf.mxu1 }
 0x4ce   : > { %v5504_v5 = vadd.f32 %v4452_v4, %v1264_v44 }
 0x4cf   : > { %v1620_v7 = vpop.f32.mrf.mxu1 }
 0x4d0   : > { %v1650_v6 = vsel %vm825_vm2, %v5504_v5, -inf  ;;  %v5536_v10 = vadd.f32 %v1620_v7, %v1263_v46 }
 0x4d1   : > { %1651 = vmax.xlane.f32.xlu0 %v1650_v6 }
 0x4d2   : > { %v1647_v12 = vsel %vm825_vm2, %v5536_v10, -inf }
 0x4da   : > { %1806 = vrot.lane.b32.xlu1 %v5271_v20, %s5033_s26 }
 0x4de   : > { %1893 = vrot.lane.b32.xlu1 %v5281_v24, %s5033_s26 }
 0x4e2   : > { %1891 = vrot.lane.b32.xlu1 %v5275_v22, %s5033_s26 }
 0x4e6   : > { %2074 = vrot.lane.b32.xlu1 %v5266_v14, %s5034_s16 }
 0x4e7   : > { %1717 = vrot.lane.b32.xlu0 %v5268_v17, %s5033_s26 }
 0x4ea   : > { %2072 = vrot.lane.b32.xlu1 %v5268_v17, %s5034_s16 }
 0x4eb   : > { %1804 = vrot.lane.b32.xlu0 %v5279_v23, %s5033_s26 }
 0x4ee   : > { %2068 = vrot.lane.b32.xlu1 %v5268_v17, %s5035_s17 }
 0x4ef   : > { %1980 = vrot.lane.b32.xlu0 %v5287_v26, %s5033_s26 }
 0x4f2   : > { %2256 = vrot.lane.b32.xlu1 %v5281_v24, %s5034_s16 }
 0x4f3   : > { %1978 = vrot.lane.b32.xlu0 %v5290_v28, %s5033_s26  ;;  %s3955_s26 = sshll.u32 %s314_s19, 4  ;;  %s6012_s26 = int_to_ptr.vmem [resolvable:$true] %s3955_s26 }
 0x4f7   : > { %2165 = vrot.lane.b32.xlu0 %v5271_v20, %s5034_s16 }
 0x4fb   : > { %2163 = vrot.lane.b32.xlu0 %v5279_v23, %s5034_s16 }
 0x4ff   : > { %2070 = vrot.lane.b32.xlu0 %v5266_v14, %s5035_s17 }
 0x50e   : > { %v1634_v8 = vpop.xlane.xlu1 %1633 }
 0x50f   : > { %v1654_v9 = vsub.f32 %v1353_v47, %v1634_v8 }
 0x510   : > { %v1631_v15 = vpop.xlane.xlu0 %1630 }
 0x511   : > { %v1663_v11 = vmul.f32 1.442695, %v1654_v9  ;;  %v1653_v18 = vsub.f32 %v1348_v49, %v1631_v15 }
 0x513   : > { %4747 = vpow2.f32 %v1663_v11  ;;  %v1661_v19 = vmul.f32 1.442695, %v1653_v18 }
 0x515   : > { %4749 = vpow2.f32 %v1661_v19 }
 0x516   : > { %1648 = vmax.xlane.f32.xlu1 %v1647_v12 }
 0x520   : > { %v5540_v13 = vpop.eup %4747 }
 0x521   : > { %v1680_v16 = vsel %vm825_vm2, %v5540_v13, 0.0 }
 0x522   : > { %1681 = vadd.xlane.f32.xlu0 %v1680_v16  ;;  %v5546_v32 = vpop.eup %4749 }
 0x523   : > { %v1677_v33 = vsel %vm825_vm2, %v5546_v32, 0.0 }
 0x527   : > { %2159 = vrot.lane.b32.xlu1 %v5279_v23, %s5035_s17 }
 0x53e   : > { %v1646_v21 = vpop.xlane.xlu0 %1645 }
 0x53f   : > { %v1658_v25 = vsub.f32 %v1535_v53, %v1646_v21 }
 0x541   : > { %v1671_v27 = vmul.f32 1.442695, %v1658_v25 }
 0x542   : > { %v1643_v29 = vpop.xlane.xlu0 %1642 }
 0x543   : > { %4751 = vpow2.f32 %v1671_v27  ;;  %v1657_v30 = vsub.f32 %v1530_v55, %v1643_v29 }
 0x545   : > { %v1669_v31 = vmul.f32 1.442695, %v1657_v30 }
 0x547   : > { %4753 = vpow2.f32 %v1669_v31 }
 0x54b   : > { %1678 = vadd.xlane.f32.xlu1 %v1677_v33 }
 0x550   : > { %v5550_v34 = vpop.eup %4751 }
 0x551   : > { %v1692_v35 = vsel %vm825_vm2, %v5550_v34, 0.0 }
 0x552   : > { %v1640_v36 = vpop.xlane.xlu1 %1639  ;;  %1693 = vadd.xlane.f32.xlu0 %v1692_v35 }
 0x553   : > { %v1656_v37 = vsub.f32 %v1444_v63, %v1640_v36 }
 0x554   : > { %v5554_v38 = vpop.eup %4753  ;;  %v1637_v39 = vpop.xlane.xlu0 %1636 }
 0x555   : > { %v1667_v44 = vmul.f32 1.442695, %v1656_v37  ;;  %v1655_v45 = vsub.f32 %v5499_v1, %v1637_v39  ;;  %v1689_v46 = vsel %vm825_vm2, %v5554_v38, 0.0 }
 0x556   : > { %v1807_v47 = vpop.permute.xlu1 %1806  ;;  %1690 = vadd.xlane.f32.xlu0 %v1689_v46 }
 0x557   : > { %4755 = vpow2.f32 %v1667_v44  ;;  %v1665_v48 = vmul.f32 1.442695, %v1655_v45  ;;  %4460 = vmatprep.subr.mxu1 %v1807_v47 }
 0x558   : > { %4461 = vmatpush3.msra.mxu1 %v1807_v47 }
 0x559   : > { %4757 = vpow2.f32 %v1665_v48 }
 0x55a   : > { %v1652_v49 = vpop.xlane.xlu0 %1651  ;;  %v1894_v53 = vpop.permute.xlu1 %1893 }
 0x55b   : > { %v1660_v50 = vsub.f32 %v5504_v5, %v1652_v49 }
 0x55d   : > { %v1675_v51 = vmul.f32 1.442695, %v1660_v50 }
 0x55e   : > { %v1718_v52 = vpop.permute.xlu0 %1717  ;;  %v1892_v2 = vpop.permute.xlu1 %1891 }
 0x55f   : > { %4759 = vpow2.f32 %v1675_v51  ;;  %4455 = vmatprep.subr.mxu0 %v1718_v52 }
 0x560   : > { %4456 = vmatpush3.msra.mxu0 %v1718_v52 }
 0x561   : > { %4467 = vmatprep.subr.mxu0 %v1894_v53 }
 0x562   : > { %v1805_v54 = vpop.permute.xlu0 %1804  ;;  %v2075_v3 = vpop.permute.xlu1 %2074 }
 0x563   : > { %4462 = vmatprep.subr.mxu1 %v1805_v54 }
 0x564   : > { %v5560_v55 = vpop.eup %4755  ;;  %4463 = vmatpush3.msra.mxu1 %v1805_v54 }
 0x565   : > { %v1686_v56 = vsel %vm825_vm2, %v5560_v55, 0.0 }
 0x566   : > { %v5564_v57 = vpop.eup %4757  ;;  %1687 = vadd.xlane.f32.xlu1 %v1686_v56  ;;  %v5566_v62 = vpop.permute.xlu0 %1980 }
 0x567   : > { %4474 = vmatprep.subr.mxu1 %v5566_v62  ;;  %v1683_v63 = vsel %vm825_vm2, %v5564_v57, 0.0  ;;  %v2073_v4 = vpop.permute.xlu1 %2072 }
 0x56a   : > { %1684 = vadd.xlane.f32.xlu1 %v1683_v63  ;;  %v1979_v16 = vpop.permute.xlu0 %1978 }
 0x56b   : > { %v2069_v5 = vpop.permute.xlu1 %2068 }
 0x56c   : > { %v5571_v0 = vpop.eup %4759 }
 0x56d   : > { %v1698_v1 = vsel %vm825_vm2, %v5571_v0, 0.0 }
 0x56e   : > { %1699 = vadd.xlane.f32.xlu0 %v1698_v1  ;;  %v5590_v15 = vpop.permute.xlu0 %2165 }
 0x56f   : > { %v2257_v6 = vpop.permute.xlu1 %2256 }
 0x572   : > { %v5594_v18 = vpop.permute.xlu0 %2163 }
 0x57b   : > { %2347 = vrot.lane.b32.xlu1 %v5287_v26, %s5034_s16 }
 0x584   : > { %2254 = vrot.lane.b32.xlu0 %v5275_v22, %s5034_s16 }
 0x588   : > { %2161 = vrot.lane.b32.xlu0 %v5271_v20, %s5035_s17 }
 0x58c   : > { %2252 = vrot.lane.b32.xlu0 %v5281_v24, %s5035_s17 }
 0x590   : > { %2341 = vrot.lane.b32.xlu0 %v5290_v28, %s5035_s17 }
 0x59f   : > { %v1649_v7 = vpop.xlane.xlu1 %1648 }
 0x5a0   : > { %v1659_v8 = vsub.f32 %v5536_v10, %v1649_v7  ;;  %v2071_v10 = vpop.permute.xlu0 %2070 }
 0x5a2   : > { %v1673_v9 = vmul.f32 1.442695, %v1659_v8  ;;  %v2066_v8 = vld [vmem:[#allocation7 + $0x20] sm:$0xff] }
 0x5a3   : > { %v5600_v19 = vpop.permute.xlu1 %2159 }
 0x5a4   : > { %4761 = vpow2.f32 %v1673_v9 }
 0x5ab   : > { %v1682_v21 = vpop.xlane.xlu0 %1681 }
 0x5ac   : > { %4763 = vrcp.f32 %v1682_v21 }
 0x5b1   : > { %v5586_v11 = vpop.eup %4761 }
 0x5b2   : > { %v1695_v12 = vsel %vm825_vm2, %v5586_v11, 0.0 }
 0x5b3   : > { %1696 = vadd.xlane.f32.xlu1 %v1695_v12 }
 0x5b9   : > { %v4764_v30 = vpop.eup %4763 }
 0x5ba   : > { %v1710_v35 = vmul.f32 %v4764_v30, %v5540_v13 }
 0x5c4   : > { %2250 = vrot.lane.b32.xlu1 %v5275_v22, %s5035_s17 }
 0x5c8   : > { %2345 = vrot.lane.b32.xlu1 %v5290_v28, %s5034_s16 }
 0x5cc   : > { %2343 = vrot.lane.b32.xlu1 %v5287_v26, %s5035_s17 }
 0x5d0   : > { %2522 = vrot.lane.b32.xlu1 %v5266_v14, %s5036_s10 }
 0x5d4   : > { %v1679_v25 = vpop.xlane.xlu1 %1678 }
 0x5d5   : > { %4765 = vrcp.f32 %v1679_v25 }
 0x5db   : > { %v1694_v27 = vpop.xlane.xlu0 %1693 }
 0x5dc   : > { %4767 = vrcp.f32 %v1694_v27 }
 0x5df   : > { %v1691_v29 = vpop.xlane.xlu0 %1690 }
 0x5e0   : > { %4769 = vrcp.f32 %v1691_v29 }
 0x5e2   : > { %v4766_v31 = vpop.eup %4765 }
 0x5e3   : > { %v1709_v33 = vmul.f32 %v4766_v31, %v5546_v32 }
 0x5e5   : > { %4457 = vmatprep.mubr.msk.f32.mxu0 %vm825_vm2, %v1709_v33 }
 0x5e6   : > { %4458 = vmatmul.mubr.msk.f32.vlgmr.msra.gmra.mxu0 %vm825_vm2, %v1710_v35 }
 0x5e7   : > { %4468 = vmatpush3.msra.mxu0 %v1894_v53 }
 0x5e8   : > { %4469 = vmatprep.subr.mxu0 %v1892_v2 }
 0x5e9   : > { %4470 = vmatpush3.msra.mxu0 %v1892_v2  ;;  %v4768_v36 = vpop.eup %4767 }
 0x5ea   : > { %4481 = vmatprep.subr.msk.mxu0 %vm474_vm1, %v2075_v3  ;;  %v1714_v45 = vmul.f32 %v4768_v36, %v5550_v34 }
 0x5ed   : > { %v4770_v37 = vpop.eup %4769 }
 0x5ee   : > { %v1713_v39 = vmul.f32 %v4770_v37, %v5554_v38 }
 0x5ef   : > { %v1688_v44 = vpop.xlane.xlu1 %1687 }
 0x5f0   : > { %4471 = vmatprep.mubr.msk.f32.mxu0 %vm825_vm2, %v1713_v39  ;;  %4771 = vrcp.f32 %v1688_v44 }
 0x5f1   : > { %4472 = vmatmul.mubr.msk.f32.vlgmr.msra.gmra.mxu0 %vm825_vm2, %v1714_v45 }
 0x5f2   : > { %4482 = vmatpush3.xpose.msk.msra.mxu0 %vm474_vm1, %v2075_v3  ;;  %4485 = vmatprep.mubr.msk.f32.mxu0 %vm474_vm1, %v2069_v5 }
 0x5f3   : > { %v1685_v13 = vpop.xlane.xlu1 %1684  ;;  %4483 = vmatprep.subr.msk.mxu0 %vm474_vm1, %v2073_v4 }
 0x5f4   : > { %4773 = vrcp.f32 %v1685_v13 }
 0x5f6   : > { %4484 = vmatpush3.xpose.msk.msra.mxu0 %vm474_vm1, %v2073_v4 }
 0x5f7   : > { %4495 = vmatprep.subr.msk.mxu0 %vm474_vm1, %v2257_v6  ;;  %v1700_v32 = vpop.xlane.xlu0 %1699  ;;  %v2348_v49 = vpop.permute.xlu1 %2347 }
 0x5f8   : > { %4775 = vrcp.f32 %v1700_v32 }
 0x5f9   : > { %4486 = vmatmul.mubr.msk.f32.vlgmr.msra.gmra.mxu0 %vm474_vm1, %v2071_v10 }
 0x5fa   : > { %4496 = vmatpush3.xpose.msk.msra.mxu0 %vm474_vm1, %v2257_v6  ;;  %v2067_v6 = vld [vmem:[#allocation7 + $0x28] sm:$0xff] }
 0x5fb   : > { %v2255_v34 = vpop.permute.xlu0 %2254 }
 0x5fc   : > { %4497 = vmatprep.subr.msk.mxu0 %vm474_vm1, %v2255_v34 }
 0x5fd   : > { %v4772_v38 = vpop.eup %4771 }
 0x5fe   : > { %4498 = vmatpush3.xpose.msk.msra.mxu0 %vm474_vm1, %v2255_v34  ;;  %v1712_v48 = vmul.f32 %v4772_v38, %v5560_v55 }
 0x5ff   : > { %v2162_v50 = vpop.permute.xlu0 %2161 }
 0x601   : > { %v4774_v46 = vpop.eup %4773 }
 0x602   : > { %v1711_v47 = vmul.f32 %v4774_v46, %v5564_v57 }
 0x603   : > { %v2253_v53 = vpop.permute.xlu0 %2252 }
 0x604   : > { %4464 = vmatprep.mubr.msk.f32.mxu1 %vm825_vm2, %v1711_v47 }
 0x605   : > { %4465 = vmatmul.mubr.msk.f32.vlgmr.msra.gmra.mxu1 %vm825_vm2, %v1712_v48  ;;  %v4776_v56 = vpop.eup %4775 }
 0x606   : > { %4475 = vmatpush3.msra.mxu1 %v5566_v62  ;;  %v1716_v1 = vmul.f32 %v4776_v56, %v5571_v0 }
 0x607   : > { %4476 = vmatprep.subr.mxu1 %v1979_v16  ;;  %v2342_v0 = vpop.permute.xlu0 %2341 }
 0x608   : > { %4477 = vmatpush3.msra.mxu1 %v1979_v16 }
 0x609   : > { %4488 = vmatprep.subr.msk.mxu1 %vm474_vm1, %v5590_v15 }
 0x63c   : > { %v1697_v51 = vpop.xlane.xlu1 %1696 }
 0x63d   : > { %4777 = vrcp.f32 %v1697_v51 }
 0x640   : > { %v2251_v52 = vpop.permute.xlu1 %2250 }
 0x641   : > { %4499 = vmatprep.mubr.msk.f32.mxu0 %vm474_vm1, %v2251_v52 }
 0x642   : > { %4500 = vmatmul.mubr.msk.f32.vlgmr.msra.gmra.mxu0 %vm474_vm1, %v2253_v53 }
 0x644   : > { %v2346_v54 = vpop.permute.xlu1 %2345 }
 0x648   : > { %v2344_v55 = vpop.permute.xlu1 %2343 }
 0x64a   : > { %v4778_v57 = vpop.eup %4777 }
 0x64b   : > { %v1715_v62 = vmul.f32 %v4778_v57, %v5586_v11 }
 0x64c   : > { %v2523_v63 = vpop.permute.xlu1 %2522 }
 0x64d   : > { %4478 = vmatprep.mubr.msk.f32.mxu1 %vm825_vm2, %v1715_v62  ;;  %4509 = vmatprep.subr.mxu0 %v2523_v63 }
 0x64e   : > { %4479 = vmatmul.mubr.msk.f32.vlgmr.msra.gmra.mxu1 %vm825_vm2, %v1716_v1  ;;  %4510 = vmatpush3.msra.mxu0 %v2523_v63 }
 0x64f   : > { %4489 = vmatpush3.xpose.msk.msra.mxu1 %vm474_vm1, %v5590_v15  ;;  %4492 = vmatprep.mubr.msk.f32.mxu1 %vm474_vm1, %v5600_v19 }
 0x650   : > { %4490 = vmatprep.subr.msk.mxu1 %vm474_vm1, %v5594_v18 }
 0x653   : > { %4491 = vmatpush3.xpose.msk.msra.mxu1 %vm474_vm1, %v5594_v18 }
 0x654   : > { %4502 = vmatprep.subr.msk.mxu1 %vm474_vm1, %v2348_v49 }
 0x656   : > { %4493 = vmatmul.mubr.msk.f32.vlgmr.msra.gmra.mxu1 %vm474_vm1, %v2162_v50 }
 0x657   : > { %4503 = vmatpush3.xpose.msk.msra.mxu1 %vm474_vm1, %v2348_v49  ;;  %4506 = vmatprep.mubr.msk.f32.mxu1 %vm474_vm1, %v2342_v0 }
 0x658   : > { %4504 = vmatprep.subr.msk.mxu1 %vm474_vm1, %v2346_v54 }
 0x65b   : > { %4505 = vmatpush3.xpose.msk.msra.mxu1 %vm474_vm1, %v2346_v54 }
 0x65e   : > { %4507 = vmatmul.mubr.msk.f32.vlgmr.msra.gmra.mxu1 %vm474_vm1, %v2344_v55 }
 0x6a6   : > { %v5650_v2 = vpop.f32.mrf.mxu0 }
 0x6a8   : > { %v5652_v3 = vpop.f32.mrf.mxu0 }
 0x6b1   : > { %v5654_v4 = vpop.f32.mrf.mxu0 }
 0x6b3   : > { %v5656_v5 = vpop.f32.mrf.mxu0 }
 0x6b9   : > { %v4487_v7 = vpop.f32.mrf.mxu0 }
 0x6ba   : > { %v2156_v9 = vadd.f32 %v4487_v7, %v2067_v6 }
 0x6bb   : > { %v2150_v11 = vpop.f32.mrf.mxu0 }
 0x6bc   : > { %v2151_v12 = vadd.f32 %v2150_v11, %v2066_v8  ;;  %v2435_v16 = vsel %vm825_vm2, %v2156_v9, -inf }
 0x6bd   : > { %2436 = vmax.xlane.f32.xlu1 %v2435_v16 }
 0x6be   : > { %v2432_v15 = vsel %vm825_vm2, %v2151_v12, -inf }
 0x6bf   : > { %2433 = vmax.xlane.f32.xlu0 %v2432_v15 }
 0x6c5   : > { %v5662_v29 = vpop.f32.mrf.mxu1 }
 0x6c7   : > { %v5664_v30 = vpop.f32.mrf.mxu1 }
 0x702   : > { %v4501_v18 = vpop.f32.mrf.mxu0 }
 0x703   : > { %v2338_v10 = vadd.f32 %v4501_v18, %v2067_v6 }
 0x704   : > { %v2332_v19 = vpop.f32.mrf.mxu0 }
 0x705   : > { %v2333_v21 = vadd.f32 %v2332_v19, %v2066_v8  ;;  %v2447_v25 = vsel %vm825_vm2, %v2338_v10, -inf }
 0x706   : > { %2448 = vmax.xlane.f32.xlu0 %v2447_v25 }
 0x707   : > { %v2444_v27 = vsel %vm825_vm2, %v2333_v21, -inf }
 0x70a   : > { %2445 = vmax.xlane.f32.xlu0 %v2444_v27 }
 0x70e   : > { %v5666_v31 = vpop.f32.mrf.mxu1 }
 0x710   : > { %v5668_v33 = vpop.f32.mrf.mxu1 }
 0x716   : > { %v4494_v35 = vpop.f32.mrf.mxu1 }
 0x717   : > { %v2247_v36 = vadd.f32 %v4494_v35, %v2067_v6 }
 0x718   : > { %v2241_v37 = vpop.f32.mrf.mxu1 }
 0x719   : > { %v5670_v39 = vadd.f32 %v2241_v37, %v2066_v8  ;;  %v2441_v44 = vsel %vm825_vm2, %v2247_v36, -inf }
 0x71a   : > { %2442 = vmax.xlane.f32.xlu1 %v2441_v44 }
 0x71b   : > { %v2438_v45 = vsel %vm825_vm2, %v5670_v39, -inf }
 0x71c   : > { %2439 = vmax.xlane.f32.xlu0 %v2438_v45 }
 0x71e   : > { %v4508_v13 = vpop.f32.mrf.mxu1 }
 0x71f   : > { %v5675_v32 = vadd.f32 %v4508_v13, %v2067_v6 }
 0x720   : > { %v2423_v48 = vpop.f32.mrf.mxu1 }
 0x721   : > { %v2453_v34 = vsel %vm825_vm2, %v5675_v32, -inf  ;;  %v5707_v49 = vadd.f32 %v2423_v48, %v2066_v8 }
 0x722   : > { %2454 = vmax.xlane.f32.xlu0 %v2453_v34 }
 0x723   : > { %v2450_v50 = vsel %vm825_vm2, %v5707_v49, -inf }
 0x72b   : > { %2609 = vrot.lane.b32.xlu1 %v5271_v20, %s5036_s10 }
 0x72f   : > { %2696 = vrot.lane.b32.xlu1 %v5281_v24, %s5036_s10 }
 0x733   : > { %2694 = vrot.lane.b32.xlu1 %v5275_v22, %s5036_s10 }
 0x737   : > { %2877 = vrot.lane.b32.xlu1 %v5266_v14, %s5037_s18 }
 0x738   : > { %2520 = vrot.lane.b32.xlu0 %v5268_v17, %s5036_s10 }
 0x73b   : > { %2875 = vrot.lane.b32.xlu1 %v5268_v17, %s5037_s18 }
 0x73c   : > { %2607 = vrot.lane.b32.xlu0 %v5279_v23, %s5036_s10 }
 0x73f   : > { %2871 = vrot.lane.b32.xlu1 %v5268_v17, %s5038_s12 }
 0x740   : > { %2783 = vrot.lane.b32.xlu0 %v5287_v26, %s5036_s10 }
 0x743   : > { %2966 = vrot.lane.b32.xlu1 %v5279_v23, %s5037_s18 }
 0x744   : > { %2781 = vrot.lane.b32.xlu0 %v5290_v28, %s5036_s10  ;;  %s6009_s10 = scalar_lea.hbm %s6063_s6, %s4196_s15 }
 0x746   : > { %v2437_v38 = vpop.xlane.xlu1 %2436 }
 0x747   : > { %v2457_v46 = vsub.f32 %v2156_v9, %v2437_v38 }
 0x748   : > { %2968 = vrot.lane.b32.xlu0 %v5271_v20, %s5037_s18  ;;  %v2434_v53 = vpop.xlane.xlu0 %2433 }
 0x749   : > { %v2466_v47 = vmul.f32 1.442695, %v2457_v46  ;;  %v2456_v54 = vsub.f32 %v2151_v12, %v2434_v53 }
 0x74b   : > { %4779 = vpow2.f32 %v2466_v47  ;;  %v2464_v55 = vmul.f32 1.442695, %v2456_v54 }
 0x74c   : > { %2873 = vrot.lane.b32.xlu0 %v5266_v14, %s5038_s12 }
 0x74d   : > { %4781 = vpow2.f32 %v2464_v55 }
 0x750   : > { %3059 = vrot.lane.b32.xlu0 %v5281_v24, %s5037_s18 }
 0x758   : > { %v5711_v51 = vpop.eup %4779 }
 0x759   : > { %v2483_v52 = vsel %vm825_vm2, %v5711_v51, 0.0 }
 0x75a   : > { %v5717_v6 = vpop.eup %4781 }
 0x75b   : > { %v2480_v7 = vsel %vm825_vm2, %v5717_v6, 0.0 }
 0x767   : > { %2451 = vmax.xlane.f32.xlu1 %v2450_v50 }
 0x76f   : > { %2484 = vadd.xlane.f32.xlu0 %v2483_v52 }
 0x778   : > { %2962 = vrot.lane.b32.xlu1 %v5279_v23, %s5038_s12 }
 0x78f   : > { %v2449_v56 = vpop.xlane.xlu0 %2448 }
 0x790   : > { %v2461_v57 = vsub.f32 %v2338_v10, %v2449_v56 }
 0x792   : > { %v2474_v62 = vmul.f32 1.442695, %v2461_v57 }
 0x793   : > { %v2446_v63 = vpop.xlane.xlu0 %2445 }
 0x794   : > { %4783 = vpow2.f32 %v2474_v62  ;;  %v2460_v1 = vsub.f32 %v2333_v21, %v2446_v63 }
 0x796   : > { %v2472_v0 = vmul.f32 1.442695, %v2460_v1 }
 0x798   : > { %4785 = vpow2.f32 %v2472_v0 }
 0x79c   : > { %2481 = vadd.xlane.f32.xlu1 %v2480_v7 }
 0x7a1   : > { %v5721_v8 = vpop.eup %4783 }
 0x7a2   : > { %v2495_v9 = vsel %vm825_vm2, %v5721_v8, 0.0 }
 0x7a3   : > { %v2443_v11 = vpop.xlane.xlu1 %2442  ;;  %2496 = vadd.xlane.f32.xlu0 %v2495_v9 }
 0x7a4   : > { %v2459_v12 = vsub.f32 %v2247_v36, %v2443_v11 }
 0x7a5   : > { %v5725_v16 = vpop.eup %4785  ;;  %v2440_v15 = vpop.xlane.xlu0 %2439 }
 0x7a6   : > { %v2470_v18 = vmul.f32 1.442695, %v2459_v12  ;;  %v2458_v10 = vsub.f32 %v5670_v39, %v2440_v15  ;;  %v2492_v19 = vsel %vm825_vm2, %v5725_v16, 0.0 }
 0x7a7   : > { %v2610_v21 = vpop.permute.xlu1 %2609  ;;  %2493 = vadd.xlane.f32.xlu0 %v2492_v19 }
 0x7a8   : > { %4787 = vpow2.f32 %v2470_v18  ;;  %v2468_v25 = vmul.f32 1.442695, %v2458_v10  ;;  %4516 = vmatprep.subr.mxu1 %v2610_v21 }
 0x7a9   : > { %4517 = vmatpush3.msra.mxu1 %v2610_v21 }
 0x7aa   : > { %4789 = vpow2.f32 %v2468_v25 }
 0x7ab   : > { %v2455_v27 = vpop.xlane.xlu0 %2454  ;;  %v2697_v44 = vpop.permute.xlu1 %2696 }
 0x7ac   : > { %v2463_v35 = vsub.f32 %v5675_v32, %v2455_v27 }
 0x7ae   : > { %v2478_v36 = vmul.f32 1.442695, %v2463_v35 }
 0x7af   : > { %v2521_v37 = vpop.permute.xlu0 %2520  ;;  %v2695_v48 = vpop.permute.xlu1 %2694 }
 0x7b0   : > { %4791 = vpow2.f32 %v2478_v36  ;;  %4511 = vmatprep.subr.mxu0 %v2521_v37 }
 0x7b1   : > { %4512 = vmatpush3.msra.mxu0 %v2521_v37 }
 0x7b2   : > { %4523 = vmatprep.subr.mxu0 %v2697_v44 }
 0x7b3   : > { %v2608_v39 = vpop.permute.xlu0 %2607  ;;  %v2878_v50 = vpop.permute.xlu1 %2877 }
 0x7b4   : > { %4518 = vmatprep.subr.mxu1 %v2608_v39 }
 0x7b5   : > { %v5731_v45 = vpop.eup %4787  ;;  %4519 = vmatpush3.msra.mxu1 %v2608_v39 }
 0x7b6   : > { %v2489_v13 = vsel %vm825_vm2, %v5731_v45, 0.0 }
 0x7b7   : > { %v5735_v34 = vpop.eup %4789  ;;  %2490 = vadd.xlane.f32.xlu1 %v2489_v13  ;;  %v5737_v38 = vpop.permute.xlu0 %2783 }
 0x7b8   : > { %4530 = vmatprep.subr.mxu1 %v5737_v38  ;;  %v2486_v32 = vsel %vm825_vm2, %v5735_v34, 0.0  ;;  %v2876_v52 = vpop.permute.xlu1 %2875 }
 0x7bb   : > { %2487 = vadd.xlane.f32.xlu1 %v2486_v32  ;;  %v2782_v1 = vpop.permute.xlu0 %2781 }
 0x7bc   : > { %v2872_v53 = vpop.permute.xlu1 %2871 }
 0x7bd   : > { %v5742_v46 = vpop.eup %4791 }
 0x7be   : > { %v2501_v47 = vsel %vm825_vm2, %v5742_v46, 0.0 }
 0x7bf   : > { %2502 = vadd.xlane.f32.xlu0 %v2501_v47  ;;  %v5763_v0 = vpop.permute.xlu0 %2968 }
 0x7c0   : > { %v5756_v54 = vpop.permute.xlu1 %2966 }
 0x7c3   : > { %v2874_v7 = vpop.permute.xlu0 %2873 }
 0x7cc   : > { %3057 = vrot.lane.b32.xlu1 %v5275_v22, %s5037_s18 }
 0x7d5   : > { %2964 = vrot.lane.b32.xlu0 %v5271_v20, %s5038_s12 }
 0x7d9   : > { %3150 = vrot.lane.b32.xlu0 %v5287_v26, %s5037_s18 }
 0x7dd   : > { %3055 = vrot.lane.b32.xlu0 %v5281_v24, %s5038_s12 }
 0x7e1   : > { %3144 = vrot.lane.b32.xlu0 %v5290_v28, %s5038_s12 }
 0x7f0   : > { %v2452_v55 = vpop.xlane.xlu1 %2451 }
 0x7f1   : > { %v2462_v56 = vsub.f32 %v5707_v49, %v2452_v55  ;;  %v3060_v49 = vpop.permute.xlu0 %3059 }
 0x7f3   : > { %v2476_v57 = vmul.f32 1.442695, %v2462_v56 }
 0x7f4   : > { %v5771_v9 = vpop.permute.xlu1 %2962 }
 0x7f5   : > { %4793 = vpow2.f32 %v2476_v57 }
 0x7f8   : > { %v2485_v11 = vpop.xlane.xlu0 %2484 }
 0x7f9   : > { %4795 = vrcp.f32 %v2485_v11 }
 0x802   : > { %v5759_v62 = vpop.eup %4793 }
 0x803   : > { %v2498_v63 = vsel %vm825_vm2, %v5759_v62, 0.0 }
 0x804   : > { %2499 = vadd.xlane.f32.xlu1 %v2498_v63 }
 0x806   : > { %v4796_v10 = vpop.eup %4795 }
 0x807   : > { %v2513_v25 = vmul.f32 %v4796_v10, %v5711_v51 }
 0x815   : > { %3053 = vrot.lane.b32.xlu1 %v5275_v22, %s5038_s12 }
 0x819   : > { %3148 = vrot.lane.b32.xlu1 %v5290_v28, %s5037_s18  ;;  %s4949_s18 = scalar_lea.vmem %s6012_s26, 1024 }
 0x81a   : > { %p4950_p7 = scmp.ne.s32.totalorder %s6012_s26, %s4949_s18 }
 0x81c   : > { %p4951_p12 = pnand %p4950_p7, %p6084_p1 }
 0x81d   : > { %3146 = vrot.lane.b32.xlu1 %v5287_v26, %s5038_s12  ;;  %s5043_s12 = smov [#allocation10]  }
 0x81e   : > { %p4952_p9 = pneg %p4951_p12 }
 0x825   : > { %v2482_v12 = vpop.xlane.xlu1 %2481 }
 0x826   : > { %4797 = vrcp.f32 %v2482_v12 }
 0x82c   : > { %v2497_v15 = vpop.xlane.xlu0 %2496 }
 0x82d   : > { %4799 = vrcp.f32 %v2497_v15 }
 0x830   : > { %v2494_v18 = vpop.xlane.xlu0 %2493 }
 0x831   : > { %4801 = vrcp.f32 %v2494_v18 }
 0x833   : > { %v4798_v19 = vpop.eup %4797 }
 0x834   : > { %v2512_v21 = vmul.f32 %v4798_v19, %v5717_v6 }
 0x836   : > { %4513 = vmatprep.mubr.msk.f32.mxu0 %vm825_vm2, %v2512_v21 }
 0x837   : > { %4514 = vmatmul.mubr.msk.f32.vlgmr.msra.gmra.mxu0 %vm825_vm2, %v2513_v25 }
 0x838   : > { %4524 = vmatpush3.msra.mxu0 %v2697_v44 }
 0x839   : > { %4525 = vmatprep.subr.mxu0 %v2695_v48 }
 0x83a   : > { %4526 = vmatpush3.msra.mxu0 %v2695_v48  ;;  %v4800_v27 = vpop.eup %4799 }
 0x83b   : > { %4537 = vmatprep.subr.msk.mxu0 %vm474_vm1, %v2878_v50  ;;  %v2517_v39 = vmul.f32 %v4800_v27, %v5721_v8 }
 0x83e   : > { %v4802_v35 = vpop.eup %4801 }
 0x83f   : > { %v2516_v36 = vmul.f32 %v4802_v35, %v5725_v16 }
 0x840   : > { %v2491_v37 = vpop.xlane.xlu1 %2490 }
 0x841   : > { %4527 = vmatprep.mubr.msk.f32.mxu0 %vm825_vm2, %v2516_v36  ;;  %4803 = vrcp.f32 %v2491_v37 }
 0x842   : > { %4528 = vmatmul.mubr.msk.f32.vlgmr.msra.gmra.mxu0 %vm825_vm2, %v2517_v39 }
 0x843   : > { %4538 = vmatpush3.xpose.msk.msra.mxu0 %vm474_vm1, %v2878_v50  ;;  %4541 = vmatprep.mubr.msk.f32.mxu0 %vm474_vm1, %v2872_v53 }
 0x844   : > { %v2488_v51 = vpop.xlane.xlu1 %2487  ;;  %4539 = vmatprep.subr.msk.mxu0 %vm474_vm1, %v2876_v52 }
 0x845   : > { %4805 = vrcp.f32 %v2488_v51 }
 0x847   : > { %4540 = vmatpush3.xpose.msk.msra.mxu0 %vm474_vm1, %v2876_v52 }
 0x848   : > { %4551 = vmatprep.subr.msk.mxu0 %vm474_vm1, %v3060_v49  ;;  %v3058_v6 = vpop.permute.xlu1 %3057  ;;  %v2503_v32 = vpop.xlane.xlu0 %2502 }
 0x849   : > { %4807 = vrcp.f32 %v2503_v32 }
 0x84a   : > { %4542 = vmatmul.mubr.msk.f32.vlgmr.msra.gmra.mxu0 %vm474_vm1, %v2874_v7 }
 0x84b   : > { %4552 = vmatpush3.xpose.msk.msra.mxu0 %vm474_vm1, %v3060_v49  ;;  %v2869_v49 = vld [vmem:[#allocation7 + $0x30] sm:$0xff] }
 0x84c   : > { %4553 = vmatprep.subr.msk.mxu0 %vm474_vm1, %v3058_v6  ;;  %v2965_v47 = vpop.permute.xlu0 %2964 }
 0x84e   : > { %v4804_v8 = vpop.eup %4803 }
 0x84f   : > { %4554 = vmatpush3.xpose.msk.msra.mxu0 %vm474_vm1, %v3058_v6  ;;  %v2515_v13 = vmul.f32 %v4804_v8, %v5731_v45 }
 0x850   : > { %v3151_v48 = vpop.permute.xlu0 %3150 }
 0x852   : > { %v4806_v16 = vpop.eup %4805 }
 0x853   : > { %v2514_v44 = vmul.f32 %v4806_v16, %v5735_v34 }
 0x854   : > { %v3056_v52 = vpop.permute.xlu0 %3055 }
 0x855   : > { %4520 = vmatprep.mubr.msk.f32.mxu1 %vm825_vm2, %v2514_v44 }
 0x856   : > { %4521 = vmatmul.mubr.msk.f32.vlgmr.msra.gmra.mxu1 %vm825_vm2, %v2515_v13  ;;  %v4808_v45 = vpop.eup %4807 }
 0x857   : > { %4531 = vmatpush3.msra.mxu1 %v5737_v38  ;;  %v2519_v55 = vmul.f32 %v4808_v45, %v5742_v46 }
 0x858   : > { %4532 = vmatprep.subr.mxu1 %v2782_v1  ;;  %v3145_v56 = vpop.permute.xlu0 %3144 }
 0x859   : > { %4533 = vmatpush3.msra.mxu1 %v2782_v1 }
 0x85a   : > { %4544 = vmatprep.subr.msk.mxu1 %vm474_vm1, %v5763_v0 }
 0x88d   : > { %v2500_v50 = vpop.xlane.xlu1 %2499 }
 0x88e   : > { %4809 = vrcp.f32 %v2500_v50 }
 0x891   : > { %v3054_v34 = vpop.permute.xlu1 %3053 }
 0x892   : > { %4555 = vmatprep.mubr.msk.f32.mxu0 %vm474_vm1, %v3054_v34 }
 0x893   : > { %4556 = vmatmul.mubr.msk.f32.vlgmr.msra.gmra.mxu0 %vm474_vm1, %v3056_v52 }
 0x895   : > { %v3149_v46 = vpop.permute.xlu1 %3148 }
 0x899   : > { %v3147_v57 = vpop.permute.xlu1 %3146 }
 0x89b   : > { %v4810_v53 = vpop.eup %4809 }
 0x89c   : > { %v2518_v38 = vmul.f32 %v4810_v53, %v5759_v62 }
 0x89e   : > { %4534 = vmatprep.mubr.msk.f32.mxu1 %vm825_vm2, %v2518_v38 }
 0x89f   : > { %4535 = vmatmul.mubr.msk.f32.vlgmr.msra.gmra.mxu1 %vm825_vm2, %v2519_v55 }
 0x8a0   : > { %4545 = vmatpush3.xpose.msk.msra.mxu1 %vm474_vm1, %v5763_v0  ;;  %4548 = vmatprep.mubr.msk.f32.mxu1 %vm474_vm1, %v5771_v9  ;;  %v2870_v0 = vld [vmem:[#allocation7 + $0x38] sm:$0xff] }
 0x8a1   : > { %4546 = vmatprep.subr.msk.mxu1 %vm474_vm1, %v5756_v54 }
 0x8a4   : > { %4547 = vmatpush3.xpose.msk.msra.mxu1 %vm474_vm1, %v5756_v54 }
 0x8a5   : > { %4558 = vmatprep.subr.msk.mxu1 %vm474_vm1, %v3151_v48 }
 0x8a7   : > { %4549 = vmatmul.mubr.msk.f32.vlgmr.msra.gmra.mxu1 %vm474_vm1, %v2965_v47 }
 0x8a8   : > { %4559 = vmatpush3.xpose.msk.msra.mxu1 %vm474_vm1, %v3151_v48  ;;  %4562 = vmatprep.mubr.msk.f32.mxu1 %vm474_vm1, %v3145_v56 }
 0x8a9   : > { %4560 = vmatprep.subr.msk.mxu1 %vm474_vm1, %v3149_v46 }
 0x8ac   : > { %4561 = vmatpush3.xpose.msk.msra.mxu1 %vm474_vm1, %v3149_v46 }
 0x8af   : > { %4563 = vmatmul.mubr.msk.f32.vlgmr.msra.gmra.mxu1 %vm474_vm1, %v3147_v57 }
 0x8f7   : > { %v5819_v62 = vpop.f32.mrf.mxu0 }
 0x8f9   : > { %v5821_v54 = vpop.f32.mrf.mxu0 }
 0x902   : > { %v5823_v63 = vpop.f32.mrf.mxu0 }
 0x904   : > { %v5825_v1 = vpop.f32.mrf.mxu0 }
 0x90a   : > { %v4543_v7 = vpop.f32.mrf.mxu0 }
 0x90b   : > { %v2959_v9 = vadd.f32 %v4543_v7, %v2870_v0 }
 0x90c   : > { %v2953_v11 = vpop.f32.mrf.mxu0 }
 0x90d   : > { %v2954_v12 = vadd.f32 %v2953_v11, %v2869_v49  ;;  %v3238_v15 = vsel %vm825_vm2, %v2959_v9, -inf }
 0x90e   : > { %3239 = vmax.xlane.f32.xlu1 %v3238_v15 }
 0x90f   : > { %v3235_v18 = vsel %vm825_vm2, %v2954_v12, -inf }
 0x910   : > { %3236 = vmax.xlane.f32.xlu0 %v3235_v18 }
 0x916   : > { %v5830_v27 = vpop.f32.mrf.mxu1 }
 0x918   : > { %v5832_v35 = vpop.f32.mrf.mxu1 }
 0x953   : > { %v4557_v10 = vpop.f32.mrf.mxu0 }
 0x954   : > { %v3141_v13 = vadd.f32 %v4557_v10, %v2870_v0 }
 0x955   : > { %v3135_v19 = vpop.f32.mrf.mxu0 }
 0x956   : > { %v3136_v21 = vadd.f32 %v3135_v19, %v2869_v49  ;;  %v3250_v34 = vsel %vm825_vm2, %v3141_v13, -inf }
 0x958   : > { %v3247_v25 = vsel %vm825_vm2, %v3136_v21, -inf }
 0x959   : > { %3248 = vmax.xlane.f32.xlu1 %v3247_v25 }
 0x95f   : > { %v5834_v36 = vpop.f32.mrf.mxu1 }
 0x961   : > { %v5836_v37 = vpop.f32.mrf.mxu1 }
 0x967   : > { %v4550_v39 = vpop.f32.mrf.mxu1 }
 0x968   : > { %v3050_v8 = vadd.f32 %v4550_v39, %v2870_v0 }
 0x969   : > { %v3044_v51 = vpop.f32.mrf.mxu1 }
 0x96a   : > { %v3045_v6 = vadd.f32 %v3044_v51, %v2869_v49  ;;  %v3244_v32 = vsel %vm825_vm2, %v3050_v8, -inf }
 0x96c   : > { %v3241_v16 = vsel %vm825_vm2, %v3045_v6, -inf }
 0x96d   : > { %3242 = vmax.xlane.f32.xlu0 %v3241_v16 }
 0x96f   : > { %v4564_v44 = vpop.f32.mrf.mxu1 }
 0x970   : > { %v3232_v50 = vadd.f32 %v4564_v44, %v2870_v0 }
 0x971   : > { %3245 = vmax.xlane.f32.xlu0 %v3244_v32  ;;  %v3226_v47 = vpop.f32.mrf.mxu1 }
 0x972   : > { %v3227_v48 = vadd.f32 %v3226_v47, %v2869_v49  ;;  %v3256_v45 = vsel %vm825_vm2, %v3232_v50, -inf }
 0x974   : > { %v3253_v52 = vsel %vm825_vm2, %v3227_v48, -inf }
 0x975   : > { %3251 = vmax.xlane.f32.xlu0 %v3250_v34  ;;  %3254 = vmax.xlane.f32.xlu1 %v3253_v52 }
 0x979   : > { %3257 = vmax.xlane.f32.xlu0 %v3256_v45 }
 0x986   : > { %3325 = vrot.lane.b32.xlu1 %v5266_v14, %s5039_s7 }
 0x98a   : > { %3412 = vrot.lane.b32.xlu1 %v5271_v20, %s5039_s7 }
 0x98e   : > { %3410 = vrot.lane.b32.xlu1 %v5279_v23, %s5039_s7 }
 0x98f   : > { %3323 = vrot.lane.b32.xlu0 %v5268_v17, %s5039_s7 }
 0x992   : > { %3497 = vrot.lane.b32.xlu1 %v5275_v22, %s5039_s7 }
 0x993   : > { %3499 = vrot.lane.b32.xlu0 %v5281_v24, %s5039_s7 }
 0x997   : > { %v3240_v53 = vpop.xlane.xlu1 %3239 }
 0x998   : > { %v3260_v38 = vsub.f32 %v2959_v9, %v3240_v53 }
 0x999   : > { %v3237_v55 = vpop.xlane.xlu0 %3236 }
 0x99a   : > { %v3269_v56 = vmul.f32 1.442695, %v3260_v38  ;;  %v3259_v14 = vsub.f32 %v2954_v12, %v3237_v55 }
 0x99c   : > { %4811 = vpow2.f32 %v3269_v56  ;;  %v3267_v46 = vmul.f32 1.442695, %v3259_v14 }
 0x99e   : > { %4813 = vpow2.f32 %v3267_v46 }
 0x9a9   : > { %v5855_v20 = vpop.eup %4811 }
 0x9aa   : > { %v3286_v23 = vsel %vm825_vm2, %v5855_v20, 0.0 }
 0x9ab   : > { %v5859_v17 = vpop.eup %4813 }
 0x9ac   : > { %v3283_v22 = vsel %vm825_vm2, %v5859_v17, 0.0 }
 0x9b2   : > { %3287 = vadd.xlane.f32.xlu0 %v3286_v23 }
 0x9b6   : > { %3284 = vadd.xlane.f32.xlu1 %v3283_v22 }
 0x9e2   : > { %v3249_v24 = vpop.xlane.xlu1 %3248 }
 0x9e3   : > { %v3263_v57 = vsub.f32 %v3136_v21, %v3249_v24 }
 0x9e5   : > { %v3275_v0 = vmul.f32 1.442695, %v3263_v57 }
 0x9e7   : > { %4815 = vpow2.f32 %v3275_v0 }
 0x9f4   : > { %v5863_v7 = vpop.eup %4815 }
 0x9f5   : > { %v3295_v49 = vsel %vm825_vm2, %v5863_v7, 0.0 }
 0x9f6   : > { %v3243_v9 = vpop.xlane.xlu0 %3242  ;;  %3296 = vadd.xlane.f32.xlu1 %v3295_v49 }
 0x9f7   : > { %v3261_v11 = vsub.f32 %v3045_v6, %v3243_v9 }
 0x9f9   : > { %v3271_v12 = vmul.f32 1.442695, %v3261_v11 }
 0x9fa   : > { %v3246_v15 = vpop.xlane.xlu0 %3245 }
 0x9fb   : > { %4817 = vpow2.f32 %v3271_v12  ;;  %v3262_v18 = vsub.f32 %v3050_v8, %v3246_v15 }
 0x9fd   : > { %v3273_v16 = vmul.f32 1.442695, %v3262_v18 }
 0x9fe   : > { %v3255_v10 = vpop.xlane.xlu1 %3254  ;;  %v3252_v19 = vpop.xlane.xlu0 %3251 }
 0x9ff   : > { %v3265_v25 = vsub.f32 %v3227_v48, %v3255_v10  ;;  %v3264_v39 = vsub.f32 %v3141_v13, %v3252_v19 }
 0xa01   : > { %v3279_v51 = vmul.f32 1.442695, %v3265_v25  ;;  %v3277_v21 = vmul.f32 1.442695, %v3264_v39 }
 0xa02   : > { %v3326_v44 = vpop.permute.xlu1 %3325  ;;  %v3258_v32 = vpop.xlane.xlu0 %3257 }
 0xa03   : > { %4819 = vpow2.f32 %v3279_v51  ;;  %v3266_v47 = vsub.f32 %v3232_v50, %v3258_v32  ;;  %4565 = vmatprep.subr.mxu0 %v3326_v44 }
 0xa04   : > { %4821 = vpow2.f32 %v3277_v21  ;;  %4566 = vmatpush3.msra.mxu0 %v3326_v44 }
 0xa05   : > { %4823 = vpow2.f32 %v3273_v16  ;;  %v3281_v6 = vmul.f32 1.442695, %v3266_v47 }
 0xa06   : > { %v3413_v34 = vpop.permute.xlu1 %3412  ;;  %v3324_v52 = vpop.permute.xlu0 %3323 }
 0xa07   : > { %4567 = vmatprep.subr.mxu0 %v3324_v52  ;;  %4572 = vmatprep.subr.mxu1 %v3413_v34  ;;  %4825 = vpow2.f32 %v3281_v6 }
 0xa08   : > { %v5867_v8 = vpop.eup %4817  ;;  %4568 = vmatpush3.msra.mxu0 %v3324_v52  ;;  %4573 = vmatpush3.msra.mxu1 %v3413_v34 }
 0xa09   : > { %v3289_v13 = vsel %vm825_vm2, %v5867_v8, 0.0 }
 0xa0a   : > { %v3411_v48 = vpop.permute.xlu1 %3410  ;;  %3290 = vadd.xlane.f32.xlu1 %v3289_v13  ;;  %v3500_v50 = vpop.permute.xlu0 %3499 }
 0xa0b   : > { %4574 = vmatprep.subr.mxu1 %v3411_v48  ;;  %4579 = vmatprep.subr.mxu0 %v3500_v50 }
 0xa0c   : > { %4575 = vmatpush3.msra.mxu1 %v3411_v48 }
 0xa10   : > { %v5871_v45 = vpop.eup %4819 }
 0xa11   : > { %v5873_v53 = vpop.eup %4821  ;;  %v3301_v38 = vsel %vm825_vm2, %v5871_v45, 0.0 }
 0xa12   : > { %3302 = vadd.xlane.f32.xlu1 %v3301_v38  ;;  %v3298_v55 = vsel %vm825_vm2, %v5873_v53, 0.0  ;;  %v5879_v56 = vpop.eup %4823 }
 0xa13   : > { %3299 = vadd.xlane.f32.xlu0 %v3298_v55  ;;  %v3292_v14 = vsel %vm825_vm2, %v5879_v56, 0.0 }
 0xa14   : > { %v5883_v46 = vpop.eup %4825 }
 0xa15   : > { %v3304_v23 = vsel %vm825_vm2, %v5883_v46, 0.0 }
 0xa17   : > { %3293 = vadd.xlane.f32.xlu0 %v3292_v14 }
 0xa1b   : > { %3305 = vadd.xlane.f32.xlu0 %v3304_v23 }
 0xa23   : > { %3584 = vrot.lane.b32.xlu1 %v5290_v28, %s5039_s7  ;;  %v3498_v28 = vpop.permute.xlu1 %3497 }
 0xa27   : > { %3681 = vrot.lane.b32.xlu1 %v5650_v2, %s5040_s27 }
 0xa2b   : > { %3713 = vrot.lane.b32.xlu1 %v5819_v62, %s5041_s29 }
 0xa2f   : > { %3685 = vrot.lane.b32.xlu1 %v5662_v29, %s5040_s27 }
 0xa31   : > { %3586 = vrot.lane.b32.xlu0 %v5287_v26, %s5039_s7  ;;  %s4953_s7 = sshll.u32 %s5043_s12, 4  ;;  %s4954_s7 = int_to_ptr.vmem [resolvable:$false] %s4953_s7 }
 0xa32   : > { %p4956_p13 = scmp.lt.s32.totalorder %s6012_s26, %s4954_s7 }
 0xa33   : > { %3717 = vrot.lane.b32.xlu1 %v5830_v27, %s5041_s29 }
 0xa35   : > { %3679 = vrot.lane.b32.xlu0 %v5652_v3, %s5040_s27 }
 0xa37   : > { %3689 = vrot.lane.b32.xlu1 %v5654_v4, %s5040_s27 }
 0xa39   : > { %3711 = vrot.lane.b32.xlu0 %v5821_v54, %s5041_s29 }
 0xa3b   : > { %3721 = vrot.lane.b32.xlu1 %v5823_v63, %s5041_s29  ;;  %v3288_v2 = vpop.xlane.xlu0 %3287 }
 0xa3c   : > { %4827 = vrcp.f32 %v3288_v2 }
 0xa3d   : > { %3683 = vrot.lane.b32.xlu0 %v5664_v30, %s5040_s27 }
 0xa3f   : > { %v3285_v26 = vpop.xlane.xlu1 %3284  ;;  %3693 = vrot.lane.b32.xlu1 %v5666_v31, %s5040_s27 }
 0xa40   : > { %4829 = vrcp.f32 %v3285_v26 }
 0xa41   : > { %3715 = vrot.lane.b32.xlu0 %v5832_v35, %s5041_s29 }
 0xa45   : > { %3687 = vrot.lane.b32.xlu0 %v5656_v5, %s5040_s27 }
 0xa49   : > { %3719 = vrot.lane.b32.xlu0 %v5825_v1, %s5041_s29  ;;  %v4828_v3 = vpop.eup %4827 }
 0xa4a   : > { %v3316_v30 = vmul.f32 %v4828_v3, %v5855_v20 }
 0xa4d   : > { %v4830_v4 = vpop.eup %4829  ;;  %3691 = vrot.lane.b32.xlu0 %v5668_v33, %s5040_s27 }
 0xa4e   : > { %v3315_v29 = vmul.f32 %v4830_v4, %v5859_v17 }
 0xa50   : > { %4569 = vmatprep.mubr.msk.f32.mxu0 %vm825_vm2, %v3315_v29 }
 0xa51   : > { %4570 = vmatmul.mubr.msk.f32.vlgmr.msra.gmra.mxu0 %vm825_vm2, %v3316_v30 }
 0xa52   : > { %4580 = vmatpush3.msra.mxu0 %v3500_v50 }
 0xa53   : > { %4581 = vmatprep.subr.mxu0 %v3498_v28 }
 0xa54   : > { %4582 = vmatpush3.msra.mxu0 %v3498_v28 }
 0xa7f   : > { %v3297_v5 = vpop.xlane.xlu1 %3296 }
 0xa80   : > { %4831 = vrcp.f32 %v3297_v5 }
 0xa8d   : > { %v4832_v31 = vpop.eup %4831 }
 0xa8e   : > { %v3319_v62 = vmul.f32 %v4832_v31, %v5863_v7 }
 0xa90   : > { %4583 = vmatprep.mubr.msk.f32.mxu0 %vm825_vm2, %v3319_v62 }
 0xa93   : > { %v3291_v54 = vpop.xlane.xlu1 %3290 }
 0xa94   : > { %4833 = vrcp.f32 %v3291_v54 }
 0xa9b   : > { %v3303_v33 = vpop.xlane.xlu1 %3302 }
 0xa9c   : > { %v3300_v63 = vpop.xlane.xlu0 %3299 }
 0xa9d   : > { %4835 = vrcp.f32 %v3300_v63 }
 0xa9e   : > { %4837 = vrcp.f32 %v3303_v33 }
 0xa9f   : > { %v3585_v1 = vpop.permute.xlu1 %3584 }
 0xaa0   : > { %v3294_v27 = vpop.xlane.xlu0 %3293 }
 0xaa1   : > { %v4834_v35 = vpop.eup %4833  ;;  %4839 = vrcp.f32 %v3294_v27 }
 0xaa2   : > { %v3317_v20 = vmul.f32 %v4834_v35, %v5867_v8 }
 0xaa3   : > { %v5926_v17 = vpop.permute.xlu1 %3681 }
 0xaa4   : > { %v3306_v22 = vpop.xlane.xlu0 %3305  ;;  %4576 = vmatprep.mubr.msk.f32.mxu1 %vm825_vm2, %v3317_v20  ;;  %v3768_v29 = vsel %vm474_vm1, %v5479_v40, %v5926_v17 }
 0xaa5   : > { %4841 = vrcp.f32 %v3306_v22 }
 0xaa7   : > { %v5929_v24 = vpop.permute.xlu1 %3713 }
 0xaa8   : > { %v3587_v57 = vpop.permute.xlu0 %3586 }
 0xaa9   : > { %4586 = vmatprep.subr.mxu1 %v3587_v57 }
 0xaaa   : > { %v4836_v0 = vpop.eup %4835 }
 0xaab   : > { %v3686_v7 = vpop.permute.xlu1 %3685  ;;  %v3320_v49 = vmul.f32 %v4836_v0, %v5873_v53  ;;  %v4838_v11 = vpop.eup %4837  ;;  %v3794_v53 = vld [vmem:[#allocation8 + $0x10] sm:$0xff] }
 0xaac   : > { %v5932_v9 = vpop.permute.xlu0 %3679  ;;  %v3770_v15 = vsel %vm474_vm1, %v5491_v58, %v3686_v7  ;;  %v3321_v39 = vmul.f32 %v4838_v11, %v5871_v45  ;;  %v3795_v45 = vld [vmem:[#allocation8 + $0x18] sm:$0xff] }
 0xaad   : > { %4584 = vmatmul.mubr.msk.f32.vlgmr.msra.gmra.mxu0 %vm825_vm2, %v3320_v49  ;;  %4593 = vmatprep.subr.mxu0 %v3795_v45  ;;  %v3767_v3 = vsel %vm474_vm1, %v5481_v41, %v5932_v9 }
 0xaae   : > { %v4840_v12 = vpop.eup %4839  ;;  %4594 = vmatpush3.msra.mxu0 %v3795_v45 }
 0xaaf   : > { %v3718_v18 = vpop.permute.xlu1 %3717  ;;  %v3318_v10 = vmul.f32 %v4840_v12, %v5879_v56  ;;  %4595 = vmatprep.subr.mxu0 %v3794_v53 }
 0xab0   : > { %v5939_v19 = vsel %vm825_vm2, %v3770_v15, %v3718_v18  ;;  %v3712_v25 = vpop.permute.xlu0 %3711  ;;  %4596 = vmatpush3.msra.mxu0 %v3794_v53 }
 0xab1   : > { %4577 = vmatmul.mubr.msk.f32.vlgmr.msra.gmra.mxu1 %vm825_vm2, %v3318_v10 }
 0xab2   : > { %v4842_v51 = vpop.eup %4841  ;;  %4587 = vmatpush3.msra.mxu1 %v3587_v57  ;;  %4590 = vmatprep.mubr.msk.f32.mxu1 %vm825_vm2, %v3321_v39 }
 0xab3   : > { %4588 = vmatprep.subr.mxu1 %v3585_v1  ;;  %v3690_v21 = vpop.permute.xlu1 %3689  ;;  %v3322_v16 = vmul.f32 %v4842_v51, %v5883_v46 }
 0xab4   : > { %4589 = vmatpush3.msra.mxu1 %v3585_v1  ;;  %v3684_v58 = vpop.permute.xlu0 %3683  ;;  %v3772_v44 = vsel %vm474_vm1, %v5483_v42, %v3690_v21  ;;  %v3793_v42 = vld [vmem:[#allocation8 + $0x8] sm:$0xff] }
 0xab5   : > { %4591 = vmatmul.mubr.msk.f32.vlgmr.msra.gmra.mxu1 %vm825_vm2, %v3322_v16  ;;  %v3769_v47 = vsel %vm474_vm1, %v5493_v59, %v3684_v58  ;;  %4597 = vmatprep.subr.mxu0 %v3793_v42  ;;  %v3792_v59 = vld [vmem:[#allocation8] sm:$0xff] }
 0xab6   : > { %4598 = vmatpush3.msra.mxu0 %v3793_v42 }
 0xab7   : > { %v3722_v32 = vpop.permute.xlu1 %3721  ;;  %4599 = vmatprep.subr.mxu0 %v3792_v59 }
 0xab8   : > { %v5951_v6 = vsel %vm825_vm2, %v3772_v44, %v3722_v32  ;;  %v3716_v34 = vpop.permute.xlu0 %3715  ;;  %4600 = vmatpush3.msra.mxu0 %v3792_v59 }
 0xab9   : > { %v3777_v52 = vsel %vm825_vm2, %v3769_v47, %v3716_v34 }
 0xabb   : > { %v3694_v2 = vpop.permute.xlu1 %3693 }
 0xabc   : > { %v3688_v8 = vpop.permute.xlu0 %3687 }
 0xabd   : > { %v3771_v13 = vsel %vm474_vm1, %v5485_v43, %v3688_v8 }
 0xac0   : > { %v3720_v48 = vpop.permute.xlu0 %3719 }
 0xac1   : > { %v3779_v50 = vsel %vm825_vm2, %v3771_v13, %v3720_v48 }
 0xac4   : > { %v3692_v26 = vpop.permute.xlu0 %3691 }
 0xac5   : > { %v3773_v17 = vsel %vm474_vm1, %v5497_v61, %v3692_v26  ;;  %v4178_v61 = vld [vmem:[%s6062_s5] ss:$0 sm:$0xff] }
 0xb11   : > { %v4571_v38 = vpop.f32.mrf.mxu0 }
 0xb12   : > { %3745 = vrot.lane.b32.xlu1 %v4571_v38, %s5042_s20 }
 0xb13   : > { %v3401_v55 = vpop.f32.mrf.mxu0 }
 0xb14   : > { %3743 = vrot.lane.b32.xlu0 %v3401_v55, %s5042_s20 }
 0xb6d   : > { %v4585_v43 = vpop.f32.mrf.mxu0 }
 0xb6e   : > { %3753 = vrot.lane.b32.xlu1 %v4585_v43, %s5042_s20 }
 0xb6f   : > { %v3575_v56 = vpop.f32.mrf.mxu0 }
 0xb70   : > { %3751 = vrot.lane.b32.xlu0 %v3575_v56, %s5042_s20 }
 0xb71   : > { %v4578_v14 = vpop.f32.mrf.mxu1 }
 0xb72   : > { %3749 = vrot.lane.b32.xlu1 %v4578_v14, %s5042_s20 }
 0xb73   : > { %v3488_v46 = vpop.f32.mrf.mxu1 }
 0xb74   : > { %3747 = vrot.lane.b32.xlu0 %v3488_v46, %s5042_s20 }
 0xb75   : > { %v4592_v23 = vpop.f32.mrf.mxu1 }
 0xb76   : > { %3725 = vrot.lane.b32.xlu1 %v5834_v36, %s5041_s29  ;;  %v3775_v36 = vsel %vm825_vm2, %v3767_v3, %v3712_v25 }
 0xb77   : > { %v3662_v28 = vpop.f32.mrf.mxu1 }
 0xb78   : > { %3723 = vrot.lane.b32.xlu0 %v5836_v37, %s5041_s29  ;;  %v3776_v37 = vsel %vm825_vm2, %v3768_v29, %v5929_v24  ;;  %v3774_v24 = vsel %vm474_vm1, %v5495_v60, %v3694_v2  ;;  %s4955_s29 = scalar_lea.vmem %s4954_s7, 2048 }
 0xb79   : > { %p4957_p0 = scmp.lt.s32.totalorder %s4955_s29, %s4949_s18 }
 0xb7a   : > { %3757 = vrot.lane.b32.xlu1 %v4592_v23, %s5042_s20 }
 0xb7b   : > { %p4958_p2 = por %p4957_p0, %p4956_p13 }
 0xb7c   : > { %3755 = vrot.lane.b32.xlu0 %v3662_v28, %s5042_s20 }
 0xb7d   : > { %p4959_p10 = pnand %p4958_p2, %p4952_p9 }
 0xb84   : > { %v3746_v4 = vpop.permute.xlu1 %3745 }
 0xb85   : > { %v3785_v31 = vsel %vm3783_vm3, %v3776_v37, %v3746_v4 }
 0xb86   : > { %v3744_v30 = vpop.permute.xlu0 %3743 }
 0xb87   : > { %v3784_v5 = vsel %vm3783_vm3, %v3775_v36, %v3744_v30 }
 0xb88   : > { %4601 = vmatprep.mubr.msk.f32.mxu0 %vm336_vm0, %v3784_v5 }
 0xb89   : > { %4602 = vmatmul.mubr.msk.f32.vlgmr.msra.gmra.mxu0 %vm336_vm0, %v3785_v31 }
 0xbe0   : > { %v3754_v41 = vpop.permute.xlu1 %3753 }
 0xbe1   : > { %v3789_v20 = vsel %vm3783_vm3, %v5951_v6, %v3754_v41 }
 0xbe2   : > { %v3752_v62 = vpop.permute.xlu0 %3751 }
 0xbe3   : > { %v3788_v27 = vsel %vm3783_vm3, %v3779_v50, %v3752_v62 }
 0xbe4   : > { %v3750_v54 = vpop.permute.xlu1 %3749 }
 0xbe5   : > { %v3787_v63 = vsel %vm3783_vm3, %v5939_v19, %v3750_v54 }
 0xbe6   : > { %v3748_v33 = vpop.permute.xlu0 %3747 }
 0xbe7   : > { %v3786_v40 = vsel %vm3783_vm3, %v3777_v52, %v3748_v33 }
 0xbe8   : > { %v3726_v1 = vpop.permute.xlu1 %3725  ;;  %4604 = vmatprep.mubr.msk.f32.mxu0 %vm336_vm0, %v3786_v40 }
 0xbe9   : > { %4605 = vmatmul.mubr.msk.f32.gmra.mxu0 %vm336_vm0, %v3787_v63  ;;  %v3782_v7 = vsel %vm825_vm2, %v3774_v24, %v3726_v1 }
 0xbea   : > { %4607 = vmatprep.mubr.msk.f32.mxu0 %vm336_vm0, %v3788_v27  ;;  %v3724_v35 = vpop.permute.xlu0 %3723 }
 0xbeb   : > { %v3781_v57 = vsel %vm825_vm2, %v3773_v17, %v3724_v35 }
 0xbec   : > { %v3758_v22 = vpop.permute.xlu1 %3757 }
 0xbed   : > { %4608 = vmatmul.mubr.msk.f32.gmra.mxu0 %vm336_vm0, %v3789_v20  ;;  %v3791_v9 = vsel %vm3783_vm3, %v3782_v7, %v3758_v22 }
 0xbee   : > { %v3756_v0 = vpop.permute.xlu0 %3755 }
 0xbef   : > { %v3790_v49 = vsel %vm3783_vm3, %v3781_v57, %v3756_v0 }
 0xbf0   : > { %4610 = vmatprep.mubr.msk.f32.mxu0 %vm336_vm0, %v3790_v49 }
 0xbf1   : > { %4611 = vmatmul.mubr.msk.f32.gmra.mxu0 %vm336_vm0, %v3791_v9 }
 0xc49   : > { %v4603_v11 = vpop.f32.mrf.mxu0 }
 0xc4a   : > { %v3899_v12 = vadd.f32 %v4603_v11, %v4178_v61 }
 0xc4b   : > { %v3893_v60 = vpop.f32.mrf.mxu0 }
 0xc4c   : > { %3933 = vst.msk [vmem:[%s314_s19 + $0x8] sm:$0xff] %vm336_vm0, %v3899_v12  ;;  %v3894_v15 = vadd.f32 %v4178_v61, %v3893_v60 }
 0xc4e   : > { %3932 = vst.msk [vmem:[%s314_s19] sm:$0xff] %vm336_vm0, %v3894_v15 }
 0xca9   : > { %v4606_v18 = vpop.f32.mrf.mxu0 }
 0xcaa   : > { %v3909_v10 = vadd.f32 %v4606_v18, %v4178_v61 }
 0xcab   : > { %v3903_v19 = vpop.f32.mrf.mxu0 }
 0xcac   : > { %3935 = vst.msk [vmem:[%s314_s19 + $0x18] sm:$0xff] %vm336_vm0, %v3909_v10  ;;  %v3904_v25 = vadd.f32 %v4178_v61, %v3903_v19 }
 0xcad   : > { %v4609_v39 = vpop.f32.mrf.mxu0 }
 0xcae   : > { %3934 = vst.msk [vmem:[%s314_s19 + $0x10] sm:$0xff] %vm336_vm0, %v3904_v25  ;;  %v3919_v51 = vadd.f32 %v4609_v39, %v4178_v61 }
 0xcaf   : > { %v3913_v21 = vpop.f32.mrf.mxu0 }
 0xcb0   : > { %3937 = vst.msk [vmem:[%s314_s19 + $0x28] sm:$0xff] %vm336_vm0, %v3919_v51  ;;  %v3914_v16 = vadd.f32 %v4178_v61, %v3913_v21 }
 0xcb1   : > { %v4612_v58 = vpop.f32.mrf.mxu0 }
 0xcb2   : > { %3936 = vst.msk [vmem:[%s314_s19 + $0x20] sm:$0xff] %vm336_vm0, %v3914_v16  ;;  %v3929_v44 = vadd.f32 %v4612_v58, %v4178_v61 }
 0xcb3   : > { %v3923_v32 = vpop.f32.mrf.mxu0 }
 0xcb4   : > { %3939 = vst.msk [vmem:[%s314_s19 + $0x38] sm:$0xff] %vm336_vm0, %v3929_v44  ;;  %v3924_v47 = vadd.f32 %v4178_v61, %v3923_v32 }
 0xcb6   : > { %3938 = vst.msk [vmem:[%s314_s19 + $0x30] sm:$0xff] %vm336_vm0, %v3924_v47 }
 0xcb7   : > { %4962 = shalt.err (!%p4959_p10)
}
 0xcb8   : > { %s4963_s20 = scalar_lea.hbm %s6009_s10, 1024  ;;  %s4967_s19 = scalar_lea.hbm %s6063_s6, 2048 }
 0xcb9   : > { %p4964_p6 = scmp.ne.s32.totalorder %s6009_s10, %s4963_s20  ;;  %p4968_p3 = scmp.lt.s32.totalorder %s6009_s10, %s6063_s6 }
 0xcba   : > { %p4969_p11 = scmp.lt.s32.totalorder %s4967_s19, %s4963_s20 }
 0xcbb   : > { %p4965_p4 = pnand %p4964_p6, %p6084_p1 }
 0xcbc   : > { %p4970_p5 = por %p4969_p11, %p4968_p3 }
 0xcbd   : > { %p4966_p8 = pneg %p4965_p4 }
 0xcbf   : > { %p4971_p7 = pnand %p4970_p5, %p4966_p8 }
 0xcc1   : > { %4974 = shalt.err (!%p4971_p7)
}
 0xcc2   : > { %s5044_s17 = smov 128  }
 0xcc3   : > { %4635 = dma.vmem_to_hbm [thread:$0]  (%p6084_p1), %s6012_s26, 1024, %s6009_s10, %s3941_s25, %s5044_s17, %s5044_s17, %s5040_s27  }
 0xcc4 PF: > { %s3970_s18 = sand.u32 1, %s5009_s21   ;;  %p6085_p12 = scmp.ne.s32.totalorder %s6071_s28, 0 }
 0xcc5   : > { %p6086_p9 = scmp.ge.s32.totalorder %s5021_s24, 2  ;;  %s3971_s12 = scalar_lea.sflag [#allocation4], %s3970_s18 }
 0xcc7   : > { %p4652_p13 = pnand %p6086_p9, %p6085_p12 }
 0xcc9   : > { %p4653_p0 = pneg %p4652_p13 }
 0xccb   : > { %5004 = dma.done.wait (%p4653_p0), %s3971_s12, 1024  }
 0xccc   : > { %5006 = vsyncadd (%p4653_p0), %s3971_s12, 4294966272  ;;  %p21_p2 = scmp.ge.s32.totalorder %s5169_s9, 4   ;;  %s6087_s21 = smov %s5013_s22 }
 0xccd   : > { %s6088_s22 = smov %s5017_s23  ;;  %s6089_s23 = smov %s5179_s11 }
 0xcce   : > { %s6090_s24 = smov %s5169_s9  ;;  %23 = sbr.rel (!%p21_p2) target bundleno = 7 (0x7), region = 104 }
 0xcd3   :  { %3976 = vsyncpa [#allocation3], 1 }
 0xcd4   :  { %3978 = vsyncpa [#allocation3 + $0x1], 1 }
 0xcd5   :  { %3979 = vsyncpa [#allocation6], 1 }
 0xcd6   :  { %3980 = vsyncpa [#allocation9], 1 }
 0xcd7   :  { %3981 = vsyncpa [#allocation4], 1 }
 0xcd8   :  { %3983 = vsyncpa [#allocation4 + $0x1], 1 }

</bundles_post_ra>
